<compile_context>
chip_gen: v7x
topology: tpu7x:2x2x1
jax: 0.10.0
libtpu: 0.0.40
codegen_flags: <defaults>
</compile_context>

<pallas_src>
import functools

import jax
import jax.numpy as jnp
from jax.experimental import pallas as pl

# ------------------------- model config (small, synthetic) -------------------
VOCAB_SIZE = 100
MAX_POS = 16
TYPE_VOCAB = 2
HIDDEN = 32
NUM_HEADS = 2
HEAD_DIM = HIDDEN // NUM_HEADS
INTERMEDIATE = 64
NUM_LAYERS = 2
NUM_CATEGORIES = 2
LN_EPS = 1e-12
USE_TANH_GELU = False   # keep BERT's exact erf-GELU by default

_INV_SQRT2 = 0.7071067811865476


# ------------------------------ fused encoder kernel --------------------------
def _encoder_kernel(emb_ref, mask_ref, *rest, batch, seq, num_layers,
                    num_heads, head_dim, eps, use_tanh_gelu):
    """Single program: full encoder + classifier head for the whole batch.

    Ref layout of `rest`:
      [emb_ln_g, emb_ln_b] +
      per layer: [wqkv, bqkv, wo, bo, ln1_g, ln1_b, wi, bi, wo2, bo2,
                  ln2_g, ln2_b]  (12 refs) +
      [cls_w, cls_b, hidden_out_ref, logits_out_ref]
    """
    hidden_out_ref = rest[-2]
    logits_out_ref = rest[-1]
    prm = rest[:-2]

    hidden = num_heads * head_dim
    scale = 1.0 / float(head_dim) ** 0.5

    def ln(x, g_ref, b_ref):
        # f32 layernorm statistics (keep off the MXU / bf16 path).
        mu = jnp.mean(x, axis=-1, keepdims=True)
        var = jnp.mean(jnp.square(x - mu), axis=-1, keepdims=True)
        return (x - mu) * jax.lax.rsqrt(var + eps) * g_ref[...] + b_ref[...]

    def mm(a, w):
        # bf16 MXU matmul with f32 accumulation (weights are already bf16, so
        # astype is a no-op on them; only activations get packed).
        return jnp.dot(a.astype(jnp.bfloat16), w.astype(jnp.bfloat16),
                       preferred_element_type=jnp.float32)

    x = ln(emb_ref[...], prm[0], prm[1])       # (B*S, H) f32

    idx = 2
    for _ in range(num_layers):
        (wqkv_ref, bqkv_ref, wo_ref, bo_ref, ln1_g, ln1_b,
         wi_ref, bi_ref, wo2_ref, bo2_ref, ln2_g, ln2_b) = prm[idx:idx + 12]
        idx += 12

        # Fused QKV projection over the whole batch: (B*S, H) @ (H, 3H).
        qkv = mm(x, wqkv_ref[...]) + bqkv_ref[...]          # (B*S, 3H) f32

        # Attention: static per-batch / per-head loop only for the tiny
        # (S, S) score/softmax/ctx step; per-head ctx is concatenated so a
        # single (B*S,H)@(H,H) matmul applies the output projection.
        ctx_rows = []
        for b in range(batch):
            r0 = b * seq
            mask_b = mask_ref[b]                            # (1, S) additive key mask
            head_ctx = []
            for h in range(num_heads):
                lo = h * head_dim
                q_h = qkv[r0:r0 + seq, lo:lo + head_dim]                           # (S, dH)
                k_h = qkv[r0:r0 + seq, hidden + lo:hidden + lo + head_dim]         # (S, dH)
                v_h = qkv[r0:r0 + seq, 2 * hidden + lo:2 * hidden + lo + head_dim] # (S, dH)

                # scores: contract last dims (q @ k^T) without materializing k.T
                s = jax.lax.dot_general(
                    q_h.astype(jnp.bfloat16), k_h.astype(jnp.bfloat16),
                    (((1,), (1,)), ((), ())),
                    preferred_element_type=jnp.float32) * scale + mask_b           # (S, S)
                s = s - jnp.max(s, axis=-1, keepdims=True)
                p = jnp.exp(s)
                p = p * pl.reciprocal(jnp.sum(p, axis=-1, keepdims=True),
                                      approx=True)          # f32 softmax, EUP recip
                head_ctx.append(mm(p, v_h))                 # (S, dH)
            ctx_rows.append(jnp.concatenate(head_ctx, axis=-1))   # (S, H)
        ctx = jnp.concatenate(ctx_rows, axis=0)                   # (B*S, H)

        attn = mm(ctx, wo_ref[...]) + bo_ref[...]           # single out-proj matmul

        # Residual + LN1 epilogue.
        h1 = ln(x + attn, ln1_g, ln1_b)

        # FFN (erf-GELU by default, matching BERT), then residual + LN2.
        ff = mm(h1, wi_ref[...]) + bi_ref[...]
        if use_tanh_gelu:
            ff = jax.nn.gelu(ff, approximate=True)
        else:
            ff = 0.5 * ff * (1.0 + jax.lax.erf(ff * _INV_SQRT2))
        ff = mm(ff, wo2_ref[...]) + bo2_ref[...]
        x = ln(h1 + ff, ln2_g, ln2_b)

    hidden_out_ref[...] = x.astype(hidden_out_ref.dtype)

    # Fused classifier head: gather the CLS row of each batch element and do
    # one tiny matmul inside the already-resident kernel.
    cls_w_ref, cls_b_ref = prm[idx], prm[idx + 1]
    cls_rows = jnp.concatenate(
        [x[b * seq:b * seq + 1, :] for b in range(batch)], axis=0)   # (B, H)
    logits_out_ref[...] = (mm(cls_rows, cls_w_ref[...])
                           + cls_b_ref[...]).astype(logits_out_ref.dtype)


def _full_spec(x):
    nd = x.ndim
    return pl.BlockSpec(x.shape, lambda i, nd=nd: (0,) * nd)


def bert_encoder_and_head(emb_flat, mask_add, params):
    """emb_flat: (B*S, H) f32; mask_add: (B, 1, S) additive key mask.

    Returns (last_hidden_flat (B*S, H) f32, logits (B, C) f32)."""
    BS, H = emb_flat.shape
    B = mask_add.shape[0]
    S = BS // B
    C = params["cls_w"].shape[1]
    I = INTERMEDIATE
    num_layers = len(params["layers"])

    inputs = [
        emb_flat, mask_add,
        params["emb_ln_g"].reshape(1, H), params["emb_ln_b"].reshape(1, H),
    ]
    for layer in params["layers"]:
        inputs += [
            layer["wqkv"], layer["bqkv"].reshape(1, -1),
            layer["wo"], layer["bo"].reshape(1, -1),
            layer["ln1_g"].reshape(1, -1), layer["ln1_b"].reshape(1, -1),
            layer["wi"], layer["bi"].reshape(1, -1),
            layer["wo2"], layer["bo2"].reshape(1, -1),
            layer["ln2_g"].reshape(1, -1), layer["ln2_b"].reshape(1, -1),
        ]
    inputs += [params["cls_w"], params["cls_b"].reshape(1, -1)]

    # Advisory cost estimate so XLA can overlap the embedding gathers / mask
    # prep with this (latency-bound) custom call.
    fl_layer = (2 * BS * H * 3 * H                 # fused QKV
                + B * NUM_HEADS * 4 * S * S * HEAD_DIM  # scores + ctx
                + 2 * BS * H * H                   # out proj
                + 2 * BS * H * I + 2 * BS * I * H)  # FFN
    flops = num_layers * fl_layer + 2 * B * H * C
    transcendentals = num_layers * (B * NUM_HEADS * S * S + BS * I) + 5 * BS
    bytes_accessed = (sum(int(x.size) * x.dtype.itemsize for x in inputs)
                      + BS * H * 4 + B * C * 4)

    kernel = functools.partial(
        _encoder_kernel, batch=B, seq=S, num_layers=num_layers,
        num_heads=NUM_HEADS, head_dim=HEAD_DIM, eps=LN_EPS,
        use_tanh_gelu=USE_TANH_GELU)

    return pl.pallas_call(
        kernel,
        out_shape=(jax.ShapeDtypeStruct((BS, H), jnp.float32),
                   jax.ShapeDtypeStruct((B, C), jnp.float32)),
        grid=(1,),
        in_specs=[_full_spec(x) for x in inputs],
        out_specs=(pl.BlockSpec((BS, H), lambda i: (0, 0)),
                   pl.BlockSpec((B, C), lambda i: (0, 0))),
        cost_estimate=pl.CostEstimate(flops=int(flops),
                                      transcendentals=int(transcendentals),
                                      bytes_accessed=int(bytes_accessed)),
    )(*inputs)


# ------------------------------ parameter init --------------------------------
def init_params(key):
    def dense(k, fan_in, fan_out):
        w = jax.random.normal(k, (fan_in, fan_out), jnp.float32) * 0.02
        b = jnp.zeros((fan_out,), jnp.float32)
        return w, b

    keys = jax.random.split(key, 8 + NUM_LAYERS)
    params = {
        "word_emb": jax.random.normal(keys[0], (VOCAB_SIZE, HIDDEN), jnp.float32) * 0.02,
        "pos_emb": jax.random.normal(keys[1], (MAX_POS, HIDDEN), jnp.float32) * 0.02,
        "type_emb": jax.random.normal(keys[2], (TYPE_VOCAB, HIDDEN), jnp.float32) * 0.02,
        "emb_ln_g": jnp.ones((HIDDEN,), jnp.float32),
        "emb_ln_b": jnp.zeros((HIDDEN,), jnp.float32),
        "layers": [],
    }
    for l in range(NUM_LAYERS):
        lkeys = jax.random.split(keys[8 + l], 6)
        wq, bq = dense(lkeys[0], HIDDEN, HIDDEN)
        wk, bk = dense(lkeys[1], HIDDEN, HIDDEN)
        wv, bv = dense(lkeys[2], HIDDEN, HIDDEN)
        wo, bo = dense(lkeys[3], HIDDEN, HIDDEN)
        wi, bi = dense(lkeys[4], HIDDEN, INTERMEDIATE)
        wo2, bo2 = dense(lkeys[5], INTERMEDIATE, HIDDEN)
        params["layers"].append({
            # QKV fused into one (H, 3H) weight / (3H,) bias; matmul weights
            # stored bf16 (MXU consumes bf16 anyway), biases / LN params f32.
            "wqkv": jnp.concatenate([wq, wk, wv], axis=1).astype(jnp.bfloat16),
            "bqkv": jnp.concatenate([bq, bk, bv], axis=0),
            "wo": wo.astype(jnp.bfloat16), "bo": bo,
            "wi": wi.astype(jnp.bfloat16), "bi": bi,
            "wo2": wo2.astype(jnp.bfloat16), "bo2": bo2,
            "ln1_g": jnp.ones((HIDDEN,), jnp.float32),
            "ln1_b": jnp.zeros((HIDDEN,), jnp.float32),
            "ln2_g": jnp.ones((HIDDEN,), jnp.float32),
            "ln2_b": jnp.zeros((HIDDEN,), jnp.float32),
        })
    cw, cb = dense(keys[3], HIDDEN, NUM_CATEGORIES)
    params["cls_w"] = cw.astype(jnp.bfloat16)
    params["cls_b"] = cb
    return params


# ------------------------------- forward pass ---------------------------------
@jax.jit
def text_classification_forward(params, input_ids, attention_mask=None,
                                position_ids=None, token_type_ids=None):
    B, S = input_ids.shape
    H = HIDDEN
    if attention_mask is None:
        attention_mask = jnp.ones((B, S), jnp.int32)
    if position_ids is None:
        position_ids = jnp.broadcast_to(jnp.arange(S, dtype=jnp.int32), (B, S))
    if token_type_ids is None:
        token_type_ids = jnp.zeros((B, S), jnp.int32)

    # Embedding gathers are glue (data-dependent gather); fused by XLA under jit.
    emb = (params["word_emb"][input_ids]
           + params["pos_emb"][position_ids]
           + params["type_emb"][token_type_ids])                     # (B, S, H)

    mask_add = ((1.0 - attention_mask.astype(jnp.float32)) * -1e9
                ).reshape(B, 1, S)                                   # key mask

    # One fused Pallas kernel: emb-LN + both transformer layers + CLS head.
    hidden_flat, logits = bert_encoder_and_head(
        emb.reshape(B * S, H), mask_add, params)
    last_hidden_state = hidden_flat.reshape(B, S, H)

    # loss_function is None in this configuration -> loss stays None,
    # matching the PyTorch module when no loss_function/label is supplied.
    return {
        "logits": logits,
        "loss": None,
        "last_hidden_state": last_hidden_state,
        "attentions": None,
        "hidden_states": None,
    }


# ----------------------------------- main --------------------------------------
if __name__ == "__main__":
    key = jax.random.PRNGKey(0)
    pkey, dkey = jax.random.split(key)
    params = init_params(pkey)

    B, S = 2, 8
    input_ids = jax.random.randint(dkey, (B, S), 0, VOCAB_SIZE, dtype=jnp.int32)
    attention_mask = jnp.ones((B, S), jnp.int32)
    token_type_ids = jnp.zeros((B, S), jnp.int32)
    position_ids = jnp.broadcast_to(jnp.arange(S, dtype=jnp.int32), (B, S))

    out = text_classification_forward(params, input_ids, attention_mask,
                                      position_ids, token_type_ids)
    jax.block_until_ready(out["logits"])
    jax.block_until_ready(out["last_hidden_state"])
    assert out["logits"].shape == (B, NUM_CATEGORIES)
    assert out["last_hidden_state"].shape == (B, S, HIDDEN)
    assert bool(jnp.all(jnp.isfinite(out["logits"])))
    assert bool(jnp.all(jnp.isfinite(out["last_hidden_state"])))
    print("KERNEL_OK")
</pallas_src>

<mosaic_0001>
module attributes {stable_mosaic.version = 11 : i64} {
  func.func @_encoder_kernel(%arg0: i32, %arg1: memref<16x32xf32, #tpu.memory_space<vmem>>, %arg2: memref<2x1x8xf32, #tpu.memory_space<vmem>>, %arg3: memref<1x32xf32, #tpu.memory_space<vmem>>, %arg4: memref<1x32xf32, #tpu.memory_space<vmem>>, %arg5: memref<32x96xbf16, #tpu.memory_space<vmem>>, %arg6: memref<1x96xf32, #tpu.memory_space<vmem>>, %arg7: memref<32x32xbf16, #tpu.memory_space<vmem>>, %arg8: memref<1x32xf32, #tpu.memory_space<vmem>>, %arg9: memref<1x32xf32, #tpu.memory_space<vmem>>, %arg10: memref<1x32xf32, #tpu.memory_space<vmem>>, %arg11: memref<32x64xbf16, #tpu.memory_space<vmem>>, %arg12: memref<1x64xf32, #tpu.memory_space<vmem>>, %arg13: memref<64x32xbf16, #tpu.memory_space<vmem>>, %arg14: memref<1x32xf32, #tpu.memory_space<vmem>>, %arg15: memref<1x32xf32, #tpu.memory_space<vmem>>, %arg16: memref<1x32xf32, #tpu.memory_space<vmem>>, %arg17: memref<32x96xbf16, #tpu.memory_space<vmem>>, %arg18: memref<1x96xf32, #tpu.memory_space<vmem>>, %arg19: memref<32x32xbf16, #tpu.memory_space<vmem>>, %arg20: memref<1x32xf32, #tpu.memory_space<vmem>>, %arg21: memref<1x32xf32, #tpu.memory_space<vmem>>, %arg22: memref<1x32xf32, #tpu.memory_space<vmem>>, %arg23: memref<32x64xbf16, #tpu.memory_space<vmem>>, %arg24: memref<1x64xf32, #tpu.memory_space<vmem>>, %arg25: memref<64x32xbf16, #tpu.memory_space<vmem>>, %arg26: memref<1x32xf32, #tpu.memory_space<vmem>>, %arg27: memref<1x32xf32, #tpu.memory_space<vmem>>, %arg28: memref<1x32xf32, #tpu.memory_space<vmem>>, %arg29: memref<32x2xbf16, #tpu.memory_space<vmem>>, %arg30: memref<1x2xf32, #tpu.memory_space<vmem>>, %arg31: memref<16x32xf32, #tpu.memory_space<vmem>>, %arg32: memref<2x2xf32, #tpu.memory_space<vmem>>) attributes {dimension_semantics = [#tpu.dimension_semantics<arbitrary>], iteration_bounds = array<i64: 1>, scalar_prefetch = 0 : i64, scratch_operands = 0 : i64, tpu.core_type = #tpu.core_type<tc>, window_params = [{pipeline_mode = #tpu.pipeline_mode<synchronous>, transform_indices = @transform_0, window_bounds = array<i64: 16, 32>}, {pipeline_mode = #tpu.pipeline_mode<synchronous>, transform_indices = @transform_1, window_bounds = array<i64: 2, 1, 8>}, {pipeline_mode = #tpu.pipeline_mode<synchronous>, transform_indices = @transform_2, window_bounds = array<i64: 1, 32>}, {pipeline_mode = #tpu.pipeline_mode<synchronous>, transform_indices = @transform_3, window_bounds = array<i64: 1, 32>}, {pipeline_mode = #tpu.pipeline_mode<synchronous>, transform_indices = @transform_4, window_bounds = array<i64: 32, 96>}, {pipeline_mode = #tpu.pipeline_mode<synchronous>, transform_indices = @transform_5, window_bounds = array<i64: 1, 96>}, {pipeline_mode = #tpu.pipeline_mode<synchronous>, transform_indices = @transform_6, window_bounds = array<i64: 32, 32>}, {pipeline_mode = #tpu.pipeline_mode<synchronous>, transform_indices = @transform_7, window_bounds = array<i64: 1, 32>}, {pipeline_mode = #tpu.pipeline_mode<synchronous>, transform_indices = @transform_8, window_bounds = array<i64: 1, 32>}, {pipeline_mode = #tpu.pipeline_mode<synchronous>, transform_indices = @transform_9, window_bounds = array<i64: 1, 32>}, {pipeline_mode = #tpu.pipeline_mode<synchronous>, transform_indices = @transform_10, window_bounds = array<i64: 32, 64>}, {pipeline_mode = #tpu.pipeline_mode<synchronous>, transform_indices = @transform_11, window_bounds = array<i64: 1, 64>}, {pipeline_mode = #tpu.pipeline_mode<synchronous>, transform_indices = @transform_12, window_bounds = array<i64: 64, 32>}, {pipeline_mode = #tpu.pipeline_mode<synchronous>, transform_indices = @transform_13, window_bounds = array<i64: 1, 32>}, {pipeline_mode = #tpu.pipeline_mode<synchronous>, transform_indices = @transform_14, window_bounds = array<i64: 1, 32>}, {pipeline_mode = #tpu.pipeline_mode<synchronous>, transform_indices = @transform_15, window_bounds = array<i64: 1, 32>}, {pipeline_mode = #tpu.pipeline_mode<synchronous>, transform_indices = @transform_16, window_bounds = array<i64: 32, 96>}, {pipeline_mode = #tpu.pipeline_mode<synchronous>, transform_indices = @transform_17, window_bounds = array<i64: 1, 96>}, {pipeline_mode = #tpu.pipeline_mode<synchronous>, transform_indices = @transform_18, window_bounds = array<i64: 32, 32>}, {pipeline_mode = #tpu.pipeline_mode<synchronous>, transform_indices = @transform_19, window_bounds = array<i64: 1, 32>}, {pipeline_mode = #tpu.pipeline_mode<synchronous>, transform_indices = @transform_20, window_bounds = array<i64: 1, 32>}, {pipeline_mode = #tpu.pipeline_mode<synchronous>, transform_indices = @transform_21, window_bounds = array<i64: 1, 32>}, {pipeline_mode = #tpu.pipeline_mode<synchronous>, transform_indices = @transform_22, window_bounds = array<i64: 32, 64>}, {pipeline_mode = #tpu.pipeline_mode<synchronous>, transform_indices = @transform_23, window_bounds = array<i64: 1, 64>}, {pipeline_mode = #tpu.pipeline_mode<synchronous>, transform_indices = @transform_24, window_bounds = array<i64: 64, 32>}, {pipeline_mode = #tpu.pipeline_mode<synchronous>, transform_indices = @transform_25, window_bounds = array<i64: 1, 32>}, {pipeline_mode = #tpu.pipeline_mode<synchronous>, transform_indices = @transform_26, window_bounds = array<i64: 1, 32>}, {pipeline_mode = #tpu.pipeline_mode<synchronous>, transform_indices = @transform_27, window_bounds = array<i64: 1, 32>}, {pipeline_mode = #tpu.pipeline_mode<synchronous>, transform_indices = @transform_28, window_bounds = array<i64: 32, 2>}, {pipeline_mode = #tpu.pipeline_mode<synchronous>, transform_indices = @transform_29, window_bounds = array<i64: 1, 2>}, {pipeline_mode = #tpu.pipeline_mode<synchronous>, transform_indices = @transform_30, window_bounds = array<i64: 16, 32>}, {pipeline_mode = #tpu.pipeline_mode<synchronous>, transform_indices = @transform_31, window_bounds = array<i64: 2, 2>}]} {
    %c0 = arith.constant 0 : index
    %c0_0 = arith.constant 0 : index
    %0 = vector.load %arg1[%c0, %c0_0] : memref<16x32xf32, #tpu.memory_space<vmem>>, vector<16x32xf32>
    %cst = arith.constant dense<0.000000e+00> : vector<16xf32>
    %1 = vector.multi_reduction <add>, %0, %cst [1] : vector<16x32xf32> to vector<16xf32>
    %2 = vector.shape_cast %1 : vector<16xf32> to vector<16x1xf32>
    %cst_1 = arith.constant 3.200000e+01 : f32
    %3 = vector.broadcast %cst_1 : f32 to vector<16x1xf32>
    %4 = arith.divf %2, %3 : vector<16x1xf32>
    %5 = vector.broadcast %4 : vector<16x1xf32> to vector<16x32xf32>
    %6 = arith.subf %0, %5 : vector<16x32xf32>
    %7 = arith.mulf %6, %6 : vector<16x32xf32>
    %cst_2 = arith.constant dense<0.000000e+00> : vector<16xf32>
    %8 = vector.multi_reduction <add>, %7, %cst_2 [1] : vector<16x32xf32> to vector<16xf32>
    %9 = vector.shape_cast %8 : vector<16xf32> to vector<16x1xf32>
    %cst_3 = arith.constant 3.200000e+01 : f32
    %10 = vector.broadcast %cst_3 : f32 to vector<16x1xf32>
    %11 = arith.divf %9, %10 : vector<16x1xf32>
    %12 = vector.broadcast %4 : vector<16x1xf32> to vector<16x32xf32>
    %13 = arith.subf %0, %12 : vector<16x32xf32>
    %cst_4 = arith.constant 9.99999996E-13 : f32
    %14 = vector.broadcast %cst_4 : f32 to vector<16x1xf32>
    %15 = arith.addf %11, %14 : vector<16x1xf32>
    %16 = math.rsqrt %15 : vector<16x1xf32>
    %17 = vector.broadcast %16 : vector<16x1xf32> to vector<16x32xf32>
    %18 = arith.mulf %13, %17 : vector<16x32xf32>
    %c0_5 = arith.constant 0 : index
    %c0_6 = arith.constant 0 : index
    %19 = vector.load %arg3[%c0_5, %c0_6] : memref<1x32xf32, #tpu.memory_space<vmem>>, vector<1x32xf32>
    %20 = vector.broadcast %19 : vector<1x32xf32> to vector<16x32xf32>
    %21 = arith.mulf %18, %20 : vector<16x32xf32>
    %c0_7 = arith.constant 0 : index
    %c0_8 = arith.constant 0 : index
    %22 = vector.load %arg4[%c0_7, %c0_8] : memref<1x32xf32, #tpu.memory_space<vmem>>, vector<1x32xf32>
    %23 = vector.broadcast %22 : vector<1x32xf32> to vector<16x32xf32>
    %24 = arith.addf %21, %23 : vector<16x32xf32>
    %c0_9 = arith.constant 0 : index
    %c0_10 = arith.constant 0 : index
    %25 = vector.load %arg5[%c0_9, %c0_10] : memref<32x96xbf16, #tpu.memory_space<vmem>>, vector<32x96xbf16>
    %26 = arith.truncf %24 : vector<16x32xf32> to vector<16x32xbf16>
    %cst_11 = arith.constant dense<0.000000e+00> : vector<16x96xf32>
    %27 = tpu.matmul %26, %25, %cst_11 {dimension_numbers = #tpu.dot_dimension_numbers<[1], [0], [0], [1], [0, 0, 1, 1], [], []>} : vector<16x32xbf16>, vector<32x96xbf16>, vector<16x96xf32> -> vector<16x96xf32>
    %c0_12 = arith.constant 0 : index
    %c0_13 = arith.constant 0 : index
    %28 = vector.load %arg6[%c0_12, %c0_13] : memref<1x96xf32, #tpu.memory_space<vmem>>, vector<1x96xf32>
    %29 = vector.broadcast %28 : vector<1x96xf32> to vector<16x96xf32>
    %30 = arith.addf %27, %29 : vector<16x96xf32>
    %c0_14 = arith.constant 0 : index
    %c0_15 = arith.constant 0 : index
    %c0_16 = arith.constant 0 : index
    %31 = vector.load %arg2[%c0_14, %c0_15, %c0_16] : memref<2x1x8xf32, #tpu.memory_space<vmem>>, vector<1x1x8xf32>
    %32 = vector.shape_cast %31 : vector<1x1x8xf32> to vector<1x8xf32>
    %33 = vector.extract_strided_slice %30 {offsets = [0, 0], sizes = [8, 16], strides = [1, 1]} : vector<16x96xf32> to vector<8x16xf32>
    %34 = vector.extract_strided_slice %30 {offsets = [0, 32], sizes = [8, 16], strides = [1, 1]} : vector<16x96xf32> to vector<8x16xf32>
    %35 = vector.extract_strided_slice %30 {offsets = [0, 64], sizes = [8, 16], strides = [1, 1]} : vector<16x96xf32> to vector<8x16xf32>
    %36 = arith.truncf %33 : vector<8x16xf32> to vector<8x16xbf16>
    %37 = arith.truncf %34 : vector<8x16xf32> to vector<8x16xbf16>
    %cst_17 = arith.constant dense<0.000000e+00> : vector<8x8xf32>
    %38 = tpu.matmul %36, %37, %cst_17 {dimension_numbers = #tpu.dot_dimension_numbers<[1], [1], [0], [0], [0, 0, 1, 0], [], []>} : vector<8x16xbf16>, vector<8x16xbf16>, vector<8x8xf32> -> vector<8x8xf32>
    %cst_18 = arith.constant 2.500000e-01 : f32
    %39 = vector.broadcast %cst_18 : f32 to vector<8x8xf32>
    %40 = arith.mulf %38, %39 : vector<8x8xf32>
    %41 = vector.broadcast %32 : vector<1x8xf32> to vector<8x8xf32>
    %42 = arith.addf %40, %41 : vector<8x8xf32>
    %cst_19 = arith.constant dense<0xFF800000> : vector<8xf32>
    %43 = vector.multi_reduction <maximumf>, %42, %cst_19 [1] : vector<8x8xf32> to vector<8xf32>
    %44 = vector.shape_cast %43 : vector<8xf32> to vector<8x1xf32>
    %45 = vector.broadcast %44 : vector<8x1xf32> to vector<8x8xf32>
    %46 = arith.subf %42, %45 : vector<8x8xf32>
    %47 = math.exp %46 : vector<8x8xf32>
    %cst_20 = arith.constant dense<0.000000e+00> : vector<8xf32>
    %48 = vector.multi_reduction <add>, %47, %cst_20 [1] : vector<8x8xf32> to vector<8xf32>
    %49 = vector.shape_cast %48 : vector<8xf32> to vector<8x1xf32>
    %50 = tpu.reciprocal %49 {approx = true} : vector<8x1xf32> -> vector<8x1xf32>
    %51 = vector.broadcast %50 : vector<8x1xf32> to vector<8x8xf32>
    %52 = arith.mulf %47, %51 : vector<8x8xf32>
    %53 = arith.truncf %52 : vector<8x8xf32> to vector<8x8xbf16>
    %54 = arith.truncf %35 : vector<8x16xf32> to vector<8x16xbf16>
    %cst_21 = arith.constant dense<0.000000e+00> : vector<8x16xf32>
    %55 = tpu.matmul %53, %54, %cst_21 {dimension_numbers = #tpu.dot_dimension_numbers<[1], [0], [0], [1], [0, 0, 1, 1], [], []>} : vector<8x8xbf16>, vector<8x16xbf16>, vector<8x16xf32> -> vector<8x16xf32>
    %56 = vector.extract_strided_slice %30 {offsets = [0, 16], sizes = [8, 16], strides = [1, 1]} : vector<16x96xf32> to vector<8x16xf32>
    %57 = vector.extract_strided_slice %30 {offsets = [0, 48], sizes = [8, 16], strides = [1, 1]} : vector<16x96xf32> to vector<8x16xf32>
    %58 = vector.extract_strided_slice %30 {offsets = [0, 80], sizes = [8, 16], strides = [1, 1]} : vector<16x96xf32> to vector<8x16xf32>
    %59 = arith.truncf %56 : vector<8x16xf32> to vector<8x16xbf16>
    %60 = arith.truncf %57 : vector<8x16xf32> to vector<8x16xbf16>
    %cst_22 = arith.constant dense<0.000000e+00> : vector<8x8xf32>
    %61 = tpu.matmul %59, %60, %cst_22 {dimension_numbers = #tpu.dot_dimension_numbers<[1], [1], [0], [0], [0, 0, 1, 0], [], []>} : vector<8x16xbf16>, vector<8x16xbf16>, vector<8x8xf32> -> vector<8x8xf32>
    %cst_23 = arith.constant 2.500000e-01 : f32
    %62 = vector.broadcast %cst_23 : f32 to vector<8x8xf32>
    %63 = arith.mulf %61, %62 : vector<8x8xf32>
    %64 = vector.broadcast %32 : vector<1x8xf32> to vector<8x8xf32>
    %65 = arith.addf %63, %64 : vector<8x8xf32>
    %cst_24 = arith.constant dense<0xFF800000> : vector<8xf32>
    %66 = vector.multi_reduction <maximumf>, %65, %cst_24 [1] : vector<8x8xf32> to vector<8xf32>
    %67 = vector.shape_cast %66 : vector<8xf32> to vector<8x1xf32>
    %68 = vector.broadcast %67 : vector<8x1xf32> to vector<8x8xf32>
    %69 = arith.subf %65, %68 : vector<8x8xf32>
    %70 = math.exp %69 : vector<8x8xf32>
    %cst_25 = arith.constant dense<0.000000e+00> : vector<8xf32>
    %71 = vector.multi_reduction <add>, %70, %cst_25 [1] : vector<8x8xf32> to vector<8xf32>
    %72 = vector.shape_cast %71 : vector<8xf32> to vector<8x1xf32>
    %73 = tpu.reciprocal %72 {approx = true} : vector<8x1xf32> -> vector<8x1xf32>
    %74 = vector.broadcast %73 : vector<8x1xf32> to vector<8x8xf32>
    %75 = arith.mulf %70, %74 : vector<8x8xf32>
    %76 = arith.truncf %75 : vector<8x8xf32> to vector<8x8xbf16>
    %77 = arith.truncf %58 : vector<8x16xf32> to vector<8x16xbf16>
    %cst_26 = arith.constant dense<0.000000e+00> : vector<8x16xf32>
    %78 = tpu.matmul %76, %77, %cst_26 {dimension_numbers = #tpu.dot_dimension_numbers<[1], [0], [0], [1], [0, 0, 1, 1], [], []>} : vector<8x8xbf16>, vector<8x16xbf16>, vector<8x16xf32> -> vector<8x16xf32>
    %79 = tpu.concatenate %55, %78 in 1 : vector<8x16xf32>, vector<8x16xf32> -> vector<8x32xf32>
    %c1 = arith.constant 1 : index
    %c0_27 = arith.constant 0 : index
    %c0_28 = arith.constant 0 : index
    %80 = vector.load %arg2[%c1, %c0_27, %c0_28] : memref<2x1x8xf32, #tpu.memory_space<vmem>>, vector<1x1x8xf32>
    %81 = vector.shape_cast %80 : vector<1x1x8xf32> to vector<1x8xf32>
    %82 = vector.extract_strided_slice %30 {offsets = [8, 0], sizes = [8, 16], strides = [1, 1]} : vector<16x96xf32> to vector<8x16xf32>
    %83 = vector.extract_strided_slice %30 {offsets = [8, 32], sizes = [8, 16], strides = [1, 1]} : vector<16x96xf32> to vector<8x16xf32>
    %84 = vector.extract_strided_slice %30 {offsets = [8, 64], sizes = [8, 16], strides = [1, 1]} : vector<16x96xf32> to vector<8x16xf32>
    %85 = arith.truncf %82 : vector<8x16xf32> to vector<8x16xbf16>
    %86 = arith.truncf %83 : vector<8x16xf32> to vector<8x16xbf16>
    %cst_29 = arith.constant dense<0.000000e+00> : vector<8x8xf32>
    %87 = tpu.matmul %85, %86, %cst_29 {dimension_numbers = #tpu.dot_dimension_numbers<[1], [1], [0], [0], [0, 0, 1, 0], [], []>} : vector<8x16xbf16>, vector<8x16xbf16>, vector<8x8xf32> -> vector<8x8xf32>
    %cst_30 = arith.constant 2.500000e-01 : f32
    %88 = vector.broadcast %cst_30 : f32 to vector<8x8xf32>
    %89 = arith.mulf %87, %88 : vector<8x8xf32>
    %90 = vector.broadcast %81 : vector<1x8xf32> to vector<8x8xf32>
    %91 = arith.addf %89, %90 : vector<8x8xf32>
    %cst_31 = arith.constant dense<0xFF800000> : vector<8xf32>
    %92 = vector.multi_reduction <maximumf>, %91, %cst_31 [1] : vector<8x8xf32> to vector<8xf32>
    %93 = vector.shape_cast %92 : vector<8xf32> to vector<8x1xf32>
    %94 = vector.broadcast %93 : vector<8x1xf32> to vector<8x8xf32>
    %95 = arith.subf %91, %94 : vector<8x8xf32>
    %96 = math.exp %95 : vector<8x8xf32>
    %cst_32 = arith.constant dense<0.000000e+00> : vector<8xf32>
    %97 = vector.multi_reduction <add>, %96, %cst_32 [1] : vector<8x8xf32> to vector<8xf32>
    %98 = vector.shape_cast %97 : vector<8xf32> to vector<8x1xf32>
    %99 = tpu.reciprocal %98 {approx = true} : vector<8x1xf32> -> vector<8x1xf32>
    %100 = vector.broadcast %99 : vector<8x1xf32> to vector<8x8xf32>
    %101 = arith.mulf %96, %100 : vector<8x8xf32>
    %102 = arith.truncf %101 : vector<8x8xf32> to vector<8x8xbf16>
    %103 = arith.truncf %84 : vector<8x16xf32> to vector<8x16xbf16>
    %cst_33 = arith.constant dense<0.000000e+00> : vector<8x16xf32>
    %104 = tpu.matmul %102, %103, %cst_33 {dimension_numbers = #tpu.dot_dimension_numbers<[1], [0], [0], [1], [0, 0, 1, 1], [], []>} : vector<8x8xbf16>, vector<8x16xbf16>, vector<8x16xf32> -> vector<8x16xf32>
    %105 = vector.extract_strided_slice %30 {offsets = [8, 16], sizes = [8, 16], strides = [1, 1]} : vector<16x96xf32> to vector<8x16xf32>
    %106 = vector.extract_strided_slice %30 {offsets = [8, 48], sizes = [8, 16], strides = [1, 1]} : vector<16x96xf32> to vector<8x16xf32>
    %107 = vector.extract_strided_slice %30 {offsets = [8, 80], sizes = [8, 16], strides = [1, 1]} : vector<16x96xf32> to vector<8x16xf32>
    %108 = arith.truncf %105 : vector<8x16xf32> to vector<8x16xbf16>
    %109 = arith.truncf %106 : vector<8x16xf32> to vector<8x16xbf16>
    %cst_34 = arith.constant dense<0.000000e+00> : vector<8x8xf32>
    %110 = tpu.matmul %108, %109, %cst_34 {dimension_numbers = #tpu.dot_dimension_numbers<[1], [1], [0], [0], [0, 0, 1, 0], [], []>} : vector<8x16xbf16>, vector<8x16xbf16>, vector<8x8xf32> -> vector<8x8xf32>
    %cst_35 = arith.constant 2.500000e-01 : f32
    %111 = vector.broadcast %cst_35 : f32 to vector<8x8xf32>
    %112 = arith.mulf %110, %111 : vector<8x8xf32>
    %113 = vector.broadcast %81 : vector<1x8xf32> to vector<8x8xf32>
    %114 = arith.addf %112, %113 : vector<8x8xf32>
    %cst_36 = arith.constant dense<0xFF800000> : vector<8xf32>
    %115 = vector.multi_reduction <maximumf>, %114, %cst_36 [1] : vector<8x8xf32> to vector<8xf32>
    %116 = vector.shape_cast %115 : vector<8xf32> to vector<8x1xf32>
    %117 = vector.broadcast %116 : vector<8x1xf32> to vector<8x8xf32>
    %118 = arith.subf %114, %117 : vector<8x8xf32>
    %119 = math.exp %118 : vector<8x8xf32>
    %cst_37 = arith.constant dense<0.000000e+00> : vector<8xf32>
    %120 = vector.multi_reduction <add>, %119, %cst_37 [1] : vector<8x8xf32> to vector<8xf32>
    %121 = vector.shape_cast %120 : vector<8xf32> to vector<8x1xf32>
    %122 = tpu.reciprocal %121 {approx = true} : vector<8x1xf32> -> vector<8x1xf32>
    %123 = vector.broadcast %122 : vector<8x1xf32> to vector<8x8xf32>
    %124 = arith.mulf %119, %123 : vector<8x8xf32>
    %125 = arith.truncf %124 : vector<8x8xf32> to vector<8x8xbf16>
    %126 = arith.truncf %107 : vector<8x16xf32> to vector<8x16xbf16>
    %cst_38 = arith.constant dense<0.000000e+00> : vector<8x16xf32>
    %127 = tpu.matmul %125, %126, %cst_38 {dimension_numbers = #tpu.dot_dimension_numbers<[1], [0], [0], [1], [0, 0, 1, 1], [], []>} : vector<8x8xbf16>, vector<8x16xbf16>, vector<8x16xf32> -> vector<8x16xf32>
    %128 = tpu.concatenate %104, %127 in 1 : vector<8x16xf32>, vector<8x16xf32> -> vector<8x32xf32>
    %129 = tpu.concatenate %79, %128 in 0 : vector<8x32xf32>, vector<8x32xf32> -> vector<16x32xf32>
    %c0_39 = arith.constant 0 : index
    %c0_40 = arith.constant 0 : index
    %130 = vector.load %arg7[%c0_39, %c0_40] : memref<32x32xbf16, #tpu.memory_space<vmem>>, vector<32x32xbf16>
    %131 = arith.truncf %129 : vector<16x32xf32> to vector<16x32xbf16>
    %cst_41 = arith.constant dense<0.000000e+00> : vector<16x32xf32>
    %132 = tpu.matmul %131, %130, %cst_41 {dimension_numbers = #tpu.dot_dimension_numbers<[1], [0], [0], [1], [0, 0, 1, 1], [], []>} : vector<16x32xbf16>, vector<32x32xbf16>, vector<16x32xf32> -> vector<16x32xf32>
    %c0_42 = arith.constant 0 : index
    %c0_43 = arith.constant 0 : index
    %133 = vector.load %arg8[%c0_42, %c0_43] : memref<1x32xf32, #tpu.memory_space<vmem>>, vector<1x32xf32>
    %134 = vector.broadcast %133 : vector<1x32xf32> to vector<16x32xf32>
    %135 = arith.addf %132, %134 : vector<16x32xf32>
    %136 = arith.addf %24, %135 : vector<16x32xf32>
    %cst_44 = arith.constant dense<0.000000e+00> : vector<16xf32>
    %137 = vector.multi_reduction <add>, %136, %cst_44 [1] : vector<16x32xf32> to vector<16xf32>
    %138 = vector.shape_cast %137 : vector<16xf32> to vector<16x1xf32>
    %cst_45 = arith.constant 3.200000e+01 : f32
    %139 = vector.broadcast %cst_45 : f32 to vector<16x1xf32>
    %140 = arith.divf %138, %139 : vector<16x1xf32>
    %141 = vector.broadcast %140 : vector<16x1xf32> to vector<16x32xf32>
    %142 = arith.subf %136, %141 : vector<16x32xf32>
    %143 = arith.mulf %142, %142 : vector<16x32xf32>
    %cst_46 = arith.constant dense<0.000000e+00> : vector<16xf32>
    %144 = vector.multi_reduction <add>, %143, %cst_46 [1] : vector<16x32xf32> to vector<16xf32>
    %145 = vector.shape_cast %144 : vector<16xf32> to vector<16x1xf32>
    %cst_47 = arith.constant 3.200000e+01 : f32
    %146 = vector.broadcast %cst_47 : f32 to vector<16x1xf32>
    %147 = arith.divf %145, %146 : vector<16x1xf32>
    %148 = vector.broadcast %140 : vector<16x1xf32> to vector<16x32xf32>
    %149 = arith.subf %136, %148 : vector<16x32xf32>
    %cst_48 = arith.constant 9.99999996E-13 : f32
    %150 = vector.broadcast %cst_48 : f32 to vector<16x1xf32>
    %151 = arith.addf %147, %150 : vector<16x1xf32>
    %152 = math.rsqrt %151 : vector<16x1xf32>
    %153 = vector.broadcast %152 : vector<16x1xf32> to vector<16x32xf32>
    %154 = arith.mulf %149, %153 : vector<16x32xf32>
    %c0_49 = arith.constant 0 : index
    %c0_50 = arith.constant 0 : index
    %155 = vector.load %arg9[%c0_49, %c0_50] : memref<1x32xf32, #tpu.memory_space<vmem>>, vector<1x32xf32>
    %156 = vector.broadcast %155 : vector<1x32xf32> to vector<16x32xf32>
    %157 = arith.mulf %154, %156 : vector<16x32xf32>
    %c0_51 = arith.constant 0 : index
    %c0_52 = arith.constant 0 : index
    %158 = vector.load %arg10[%c0_51, %c0_52] : memref<1x32xf32, #tpu.memory_space<vmem>>, vector<1x32xf32>
    %159 = vector.broadcast %158 : vector<1x32xf32> to vector<16x32xf32>
    %160 = arith.addf %157, %159 : vector<16x32xf32>
    %c0_53 = arith.constant 0 : index
    %c0_54 = arith.constant 0 : index
    %161 = vector.load %arg11[%c0_53, %c0_54] : memref<32x64xbf16, #tpu.memory_space<vmem>>, vector<32x64xbf16>
    %162 = arith.truncf %160 : vector<16x32xf32> to vector<16x32xbf16>
    %cst_55 = arith.constant dense<0.000000e+00> : vector<16x64xf32>
    %163 = tpu.matmul %162, %161, %cst_55 {dimension_numbers = #tpu.dot_dimension_numbers<[1], [0], [0], [1], [0, 0, 1, 1], [], []>} : vector<16x32xbf16>, vector<32x64xbf16>, vector<16x64xf32> -> vector<16x64xf32>
    %c0_56 = arith.constant 0 : index
    %c0_57 = arith.constant 0 : index
    %164 = vector.load %arg12[%c0_56, %c0_57] : memref<1x64xf32, #tpu.memory_space<vmem>>, vector<1x64xf32>
    %165 = vector.broadcast %164 : vector<1x64xf32> to vector<16x64xf32>
    %166 = arith.addf %163, %165 : vector<16x64xf32>
    %cst_58 = arith.constant 5.000000e-01 : f32
    %167 = vector.broadcast %cst_58 : f32 to vector<16x64xf32>
    %168 = arith.mulf %167, %166 : vector<16x64xf32>
    %cst_59 = arith.constant 0.707106769 : f32
    %169 = vector.broadcast %cst_59 : f32 to vector<16x64xf32>
    %170 = arith.mulf %166, %169 : vector<16x64xf32>
    %171 = math.erf %170 : vector<16x64xf32>
    %cst_60 = arith.constant 1.000000e+00 : f32
    %172 = vector.broadcast %cst_60 : f32 to vector<16x64xf32>
    %173 = arith.addf %172, %171 : vector<16x64xf32>
    %174 = arith.mulf %168, %173 : vector<16x64xf32>
    %c0_61 = arith.constant 0 : index
    %c0_62 = arith.constant 0 : index
    %175 = vector.load %arg13[%c0_61, %c0_62] : memref<64x32xbf16, #tpu.memory_space<vmem>>, vector<64x32xbf16>
    %176 = arith.truncf %174 : vector<16x64xf32> to vector<16x64xbf16>
    %cst_63 = arith.constant dense<0.000000e+00> : vector<16x32xf32>
    %177 = tpu.matmul %176, %175, %cst_63 {dimension_numbers = #tpu.dot_dimension_numbers<[1], [0], [0], [1], [0, 0, 1, 1], [], []>} : vector<16x64xbf16>, vector<64x32xbf16>, vector<16x32xf32> -> vector<16x32xf32>
    %c0_64 = arith.constant 0 : index
    %c0_65 = arith.constant 0 : index
    %178 = vector.load %arg14[%c0_64, %c0_65] : memref<1x32xf32, #tpu.memory_space<vmem>>, vector<1x32xf32>
    %179 = vector.broadcast %178 : vector<1x32xf32> to vector<16x32xf32>
    %180 = arith.addf %177, %179 : vector<16x32xf32>
    %181 = arith.addf %160, %180 : vector<16x32xf32>
    %cst_66 = arith.constant dense<0.000000e+00> : vector<16xf32>
    %182 = vector.multi_reduction <add>, %181, %cst_66 [1] : vector<16x32xf32> to vector<16xf32>
    %183 = vector.shape_cast %182 : vector<16xf32> to vector<16x1xf32>
    %cst_67 = arith.constant 3.200000e+01 : f32
    %184 = vector.broadcast %cst_67 : f32 to vector<16x1xf32>
    %185 = arith.divf %183, %184 : vector<16x1xf32>
    %186 = vector.broadcast %185 : vector<16x1xf32> to vector<16x32xf32>
    %187 = arith.subf %181, %186 : vector<16x32xf32>
    %188 = arith.mulf %187, %187 : vector<16x32xf32>
    %cst_68 = arith.constant dense<0.000000e+00> : vector<16xf32>
    %189 = vector.multi_reduction <add>, %188, %cst_68 [1] : vector<16x32xf32> to vector<16xf32>
    %190 = vector.shape_cast %189 : vector<16xf32> to vector<16x1xf32>
    %cst_69 = arith.constant 3.200000e+01 : f32
    %191 = vector.broadcast %cst_69 : f32 to vector<16x1xf32>
    %192 = arith.divf %190, %191 : vector<16x1xf32>
    %193 = vector.broadcast %185 : vector<16x1xf32> to vector<16x32xf32>
    %194 = arith.subf %181, %193 : vector<16x32xf32>
    %cst_70 = arith.constant 9.99999996E-13 : f32
    %195 = vector.broadcast %cst_70 : f32 to vector<16x1xf32>
    %196 = arith.addf %192, %195 : vector<16x1xf32>
    %197 = math.rsqrt %196 : vector<16x1xf32>
    %198 = vector.broadcast %197 : vector<16x1xf32> to vector<16x32xf32>
    %199 = arith.mulf %194, %198 : vector<16x32xf32>
    %c0_71 = arith.constant 0 : index
    %c0_72 = arith.constant 0 : index
    %200 = vector.load %arg15[%c0_71, %c0_72] : memref<1x32xf32, #tpu.memory_space<vmem>>, vector<1x32xf32>
    %201 = vector.broadcast %200 : vector<1x32xf32> to vector<16x32xf32>
    %202 = arith.mulf %199, %201 : vector<16x32xf32>
    %c0_73 = arith.constant 0 : index
    %c0_74 = arith.constant 0 : index
    %203 = vector.load %arg16[%c0_73, %c0_74] : memref<1x32xf32, #tpu.memory_space<vmem>>, vector<1x32xf32>
    %204 = vector.broadcast %203 : vector<1x32xf32> to vector<16x32xf32>
    %205 = arith.addf %202, %204 : vector<16x32xf32>
    %c0_75 = arith.constant 0 : index
    %c0_76 = arith.constant 0 : index
    %206 = vector.load %arg17[%c0_75, %c0_76] : memref<32x96xbf16, #tpu.memory_space<vmem>>, vector<32x96xbf16>
    %207 = arith.truncf %205 : vector<16x32xf32> to vector<16x32xbf16>
    %cst_77 = arith.constant dense<0.000000e+00> : vector<16x96xf32>
    %208 = tpu.matmul %207, %206, %cst_77 {dimension_numbers = #tpu.dot_dimension_numbers<[1], [0], [0], [1], [0, 0, 1, 1], [], []>} : vector<16x32xbf16>, vector<32x96xbf16>, vector<16x96xf32> -> vector<16x96xf32>
    %c0_78 = arith.constant 0 : index
    %c0_79 = arith.constant 0 : index
    %209 = vector.load %arg18[%c0_78, %c0_79] : memref<1x96xf32, #tpu.memory_space<vmem>>, vector<1x96xf32>
    %210 = vector.broadcast %209 : vector<1x96xf32> to vector<16x96xf32>
    %211 = arith.addf %208, %210 : vector<16x96xf32>
    %c0_80 = arith.constant 0 : index
    %c0_81 = arith.constant 0 : index
    %c0_82 = arith.constant 0 : index
    %212 = vector.load %arg2[%c0_80, %c0_81, %c0_82] : memref<2x1x8xf32, #tpu.memory_space<vmem>>, vector<1x1x8xf32>
    %213 = vector.shape_cast %212 : vector<1x1x8xf32> to vector<1x8xf32>
    %214 = vector.extract_strided_slice %211 {offsets = [0, 0], sizes = [8, 16], strides = [1, 1]} : vector<16x96xf32> to vector<8x16xf32>
    %215 = vector.extract_strided_slice %211 {offsets = [0, 32], sizes = [8, 16], strides = [1, 1]} : vector<16x96xf32> to vector<8x16xf32>
    %216 = vector.extract_strided_slice %211 {offsets = [0, 64], sizes = [8, 16], strides = [1, 1]} : vector<16x96xf32> to vector<8x16xf32>
    %217 = arith.truncf %214 : vector<8x16xf32> to vector<8x16xbf16>
    %218 = arith.truncf %215 : vector<8x16xf32> to vector<8x16xbf16>
    %cst_83 = arith.constant dense<0.000000e+00> : vector<8x8xf32>
    %219 = tpu.matmul %217, %218, %cst_83 {dimension_numbers = #tpu.dot_dimension_numbers<[1], [1], [0], [0], [0, 0, 1, 0], [], []>} : vector<8x16xbf16>, vector<8x16xbf16>, vector<8x8xf32> -> vector<8x8xf32>
    %cst_84 = arith.constant 2.500000e-01 : f32
    %220 = vector.broadcast %cst_84 : f32 to vector<8x8xf32>
    %221 = arith.mulf %219, %220 : vector<8x8xf32>
    %222 = vector.broadcast %213 : vector<1x8xf32> to vector<8x8xf32>
    %223 = arith.addf %221, %222 : vector<8x8xf32>
    %cst_85 = arith.constant dense<0xFF800000> : vector<8xf32>
    %224 = vector.multi_reduction <maximumf>, %223, %cst_85 [1] : vector<8x8xf32> to vector<8xf32>
    %225 = vector.shape_cast %224 : vector<8xf32> to vector<8x1xf32>
    %226 = vector.broadcast %225 : vector<8x1xf32> to vector<8x8xf32>
    %227 = arith.subf %223, %226 : vector<8x8xf32>
    %228 = math.exp %227 : vector<8x8xf32>
    %cst_86 = arith.constant dense<0.000000e+00> : vector<8xf32>
    %229 = vector.multi_reduction <add>, %228, %cst_86 [1] : vector<8x8xf32> to vector<8xf32>
    %230 = vector.shape_cast %229 : vector<8xf32> to vector<8x1xf32>
    %231 = tpu.reciprocal %230 {approx = true} : vector<8x1xf32> -> vector<8x1xf32>
    %232 = vector.broadcast %231 : vector<8x1xf32> to vector<8x8xf32>
    %233 = arith.mulf %228, %232 : vector<8x8xf32>
    %234 = arith.truncf %233 : vector<8x8xf32> to vector<8x8xbf16>
    %235 = arith.truncf %216 : vector<8x16xf32> to vector<8x16xbf16>
    %cst_87 = arith.constant dense<0.000000e+00> : vector<8x16xf32>
    %236 = tpu.matmul %234, %235, %cst_87 {dimension_numbers = #tpu.dot_dimension_numbers<[1], [0], [0], [1], [0, 0, 1, 1], [], []>} : vector<8x8xbf16>, vector<8x16xbf16>, vector<8x16xf32> -> vector<8x16xf32>
    %237 = vector.extract_strided_slice %211 {offsets = [0, 16], sizes = [8, 16], strides = [1, 1]} : vector<16x96xf32> to vector<8x16xf32>
    %238 = vector.extract_strided_slice %211 {offsets = [0, 48], sizes = [8, 16], strides = [1, 1]} : vector<16x96xf32> to vector<8x16xf32>
    %239 = vector.extract_strided_slice %211 {offsets = [0, 80], sizes = [8, 16], strides = [1, 1]} : vector<16x96xf32> to vector<8x16xf32>
    %240 = arith.truncf %237 : vector<8x16xf32> to vector<8x16xbf16>
    %241 = arith.truncf %238 : vector<8x16xf32> to vector<8x16xbf16>
    %cst_88 = arith.constant dense<0.000000e+00> : vector<8x8xf32>
    %242 = tpu.matmul %240, %241, %cst_88 {dimension_numbers = #tpu.dot_dimension_numbers<[1], [1], [0], [0], [0, 0, 1, 0], [], []>} : vector<8x16xbf16>, vector<8x16xbf16>, vector<8x8xf32> -> vector<8x8xf32>
    %cst_89 = arith.constant 2.500000e-01 : f32
    %243 = vector.broadcast %cst_89 : f32 to vector<8x8xf32>
    %244 = arith.mulf %242, %243 : vector<8x8xf32>
    %245 = vector.broadcast %213 : vector<1x8xf32> to vector<8x8xf32>
    %246 = arith.addf %244, %245 : vector<8x8xf32>
    %cst_90 = arith.constant dense<0xFF800000> : vector<8xf32>
    %247 = vector.multi_reduction <maximumf>, %246, %cst_90 [1] : vector<8x8xf32> to vector<8xf32>
    %248 = vector.shape_cast %247 : vector<8xf32> to vector<8x1xf32>
    %249 = vector.broadcast %248 : vector<8x1xf32> to vector<8x8xf32>
    %250 = arith.subf %246, %249 : vector<8x8xf32>
    %251 = math.exp %250 : vector<8x8xf32>
    %cst_91 = arith.constant dense<0.000000e+00> : vector<8xf32>
    %252 = vector.multi_reduction <add>, %251, %cst_91 [1] : vector<8x8xf32> to vector<8xf32>
    %253 = vector.shape_cast %252 : vector<8xf32> to vector<8x1xf32>
    %254 = tpu.reciprocal %253 {approx = true} : vector<8x1xf32> -> vector<8x1xf32>
    %255 = vector.broadcast %254 : vector<8x1xf32> to vector<8x8xf32>
    %256 = arith.mulf %251, %255 : vector<8x8xf32>
    %257 = arith.truncf %256 : vector<8x8xf32> to vector<8x8xbf16>
    %258 = arith.truncf %239 : vector<8x16xf32> to vector<8x16xbf16>
    %cst_92 = arith.constant dense<0.000000e+00> : vector<8x16xf32>
    %259 = tpu.matmul %257, %258, %cst_92 {dimension_numbers = #tpu.dot_dimension_numbers<[1], [0], [0], [1], [0, 0, 1, 1], [], []>} : vector<8x8xbf16>, vector<8x16xbf16>, vector<8x16xf32> -> vector<8x16xf32>
    %260 = tpu.concatenate %236, %259 in 1 : vector<8x16xf32>, vector<8x16xf32> -> vector<8x32xf32>
    %c1_93 = arith.constant 1 : index
    %c0_94 = arith.constant 0 : index
    %c0_95 = arith.constant 0 : index
    %261 = vector.load %arg2[%c1_93, %c0_94, %c0_95] : memref<2x1x8xf32, #tpu.memory_space<vmem>>, vector<1x1x8xf32>
    %262 = vector.shape_cast %261 : vector<1x1x8xf32> to vector<1x8xf32>
    %263 = vector.extract_strided_slice %211 {offsets = [8, 0], sizes = [8, 16], strides = [1, 1]} : vector<16x96xf32> to vector<8x16xf32>
    %264 = vector.extract_strided_slice %211 {offsets = [8, 32], sizes = [8, 16], strides = [1, 1]} : vector<16x96xf32> to vector<8x16xf32>
    %265 = vector.extract_strided_slice %211 {offsets = [8, 64], sizes = [8, 16], strides = [1, 1]} : vector<16x96xf32> to vector<8x16xf32>
    %266 = arith.truncf %263 : vector<8x16xf32> to vector<8x16xbf16>
    %267 = arith.truncf %264 : vector<8x16xf32> to vector<8x16xbf16>
    %cst_96 = arith.constant dense<0.000000e+00> : vector<8x8xf32>
    %268 = tpu.matmul %266, %267, %cst_96 {dimension_numbers = #tpu.dot_dimension_numbers<[1], [1], [0], [0], [0, 0, 1, 0], [], []>} : vector<8x16xbf16>, vector<8x16xbf16>, vector<8x8xf32> -> vector<8x8xf32>
    %cst_97 = arith.constant 2.500000e-01 : f32
    %269 = vector.broadcast %cst_97 : f32 to vector<8x8xf32>
    %270 = arith.mulf %268, %269 : vector<8x8xf32>
    %271 = vector.broadcast %262 : vector<1x8xf32> to vector<8x8xf32>
    %272 = arith.addf %270, %271 : vector<8x8xf32>
    %cst_98 = arith.constant dense<0xFF800000> : vector<8xf32>
    %273 = vector.multi_reduction <maximumf>, %272, %cst_98 [1] : vector<8x8xf32> to vector<8xf32>
    %274 = vector.shape_cast %273 : vector<8xf32> to vector<8x1xf32>
    %275 = vector.broadcast %274 : vector<8x1xf32> to vector<8x8xf32>
    %276 = arith.subf %272, %275 : vector<8x8xf32>
    %277 = math.exp %276 : vector<8x8xf32>
    %cst_99 = arith.constant dense<0.000000e+00> : vector<8xf32>
    %278 = vector.multi_reduction <add>, %277, %cst_99 [1] : vector<8x8xf32> to vector<8xf32>
    %279 = vector.shape_cast %278 : vector<8xf32> to vector<8x1xf32>
    %280 = tpu.reciprocal %279 {approx = true} : vector<8x1xf32> -> vector<8x1xf32>
    %281 = vector.broadcast %280 : vector<8x1xf32> to vector<8x8xf32>
    %282 = arith.mulf %277, %281 : vector<8x8xf32>
    %283 = arith.truncf %282 : vector<8x8xf32> to vector<8x8xbf16>
    %284 = arith.truncf %265 : vector<8x16xf32> to vector<8x16xbf16>
    %cst_100 = arith.constant dense<0.000000e+00> : vector<8x16xf32>
    %285 = tpu.matmul %283, %284, %cst_100 {dimension_numbers = #tpu.dot_dimension_numbers<[1], [0], [0], [1], [0, 0, 1, 1], [], []>} : vector<8x8xbf16>, vector<8x16xbf16>, vector<8x16xf32> -> vector<8x16xf32>
    %286 = vector.extract_strided_slice %211 {offsets = [8, 16], sizes = [8, 16], strides = [1, 1]} : vector<16x96xf32> to vector<8x16xf32>
    %287 = vector.extract_strided_slice %211 {offsets = [8, 48], sizes = [8, 16], strides = [1, 1]} : vector<16x96xf32> to vector<8x16xf32>
    %288 = vector.extract_strided_slice %211 {offsets = [8, 80], sizes = [8, 16], strides = [1, 1]} : vector<16x96xf32> to vector<8x16xf32>
    %289 = arith.truncf %286 : vector<8x16xf32> to vector<8x16xbf16>
    %290 = arith.truncf %287 : vector<8x16xf32> to vector<8x16xbf16>
    %cst_101 = arith.constant dense<0.000000e+00> : vector<8x8xf32>
    %291 = tpu.matmul %289, %290, %cst_101 {dimension_numbers = #tpu.dot_dimension_numbers<[1], [1], [0], [0], [0, 0, 1, 0], [], []>} : vector<8x16xbf16>, vector<8x16xbf16>, vector<8x8xf32> -> vector<8x8xf32>
    %cst_102 = arith.constant 2.500000e-01 : f32
    %292 = vector.broadcast %cst_102 : f32 to vector<8x8xf32>
    %293 = arith.mulf %291, %292 : vector<8x8xf32>
    %294 = vector.broadcast %262 : vector<1x8xf32> to vector<8x8xf32>
    %295 = arith.addf %293, %294 : vector<8x8xf32>
    %cst_103 = arith.constant dense<0xFF800000> : vector<8xf32>
    %296 = vector.multi_reduction <maximumf>, %295, %cst_103 [1] : vector<8x8xf32> to vector<8xf32>
    %297 = vector.shape_cast %296 : vector<8xf32> to vector<8x1xf32>
    %298 = vector.broadcast %297 : vector<8x1xf32> to vector<8x8xf32>
    %299 = arith.subf %295, %298 : vector<8x8xf32>
    %300 = math.exp %299 : vector<8x8xf32>
    %cst_104 = arith.constant dense<0.000000e+00> : vector<8xf32>
    %301 = vector.multi_reduction <add>, %300, %cst_104 [1] : vector<8x8xf32> to vector<8xf32>
    %302 = vector.shape_cast %301 : vector<8xf32> to vector<8x1xf32>
    %303 = tpu.reciprocal %302 {approx = true} : vector<8x1xf32> -> vector<8x1xf32>
    %304 = vector.broadcast %303 : vector<8x1xf32> to vector<8x8xf32>
    %305 = arith.mulf %300, %304 : vector<8x8xf32>
    %306 = arith.truncf %305 : vector<8x8xf32> to vector<8x8xbf16>
    %307 = arith.truncf %288 : vector<8x16xf32> to vector<8x16xbf16>
    %cst_105 = arith.constant dense<0.000000e+00> : vector<8x16xf32>
    %308 = tpu.matmul %306, %307, %cst_105 {dimension_numbers = #tpu.dot_dimension_numbers<[1], [0], [0], [1], [0, 0, 1, 1], [], []>} : vector<8x8xbf16>, vector<8x16xbf16>, vector<8x16xf32> -> vector<8x16xf32>
    %309 = tpu.concatenate %285, %308 in 1 : vector<8x16xf32>, vector<8x16xf32> -> vector<8x32xf32>
    %310 = tpu.concatenate %260, %309 in 0 : vector<8x32xf32>, vector<8x32xf32> -> vector<16x32xf32>
    %c0_106 = arith.constant 0 : index
    %c0_107 = arith.constant 0 : index
    %311 = vector.load %arg19[%c0_106, %c0_107] : memref<32x32xbf16, #tpu.memory_space<vmem>>, vector<32x32xbf16>
    %312 = arith.truncf %310 : vector<16x32xf32> to vector<16x32xbf16>
    %cst_108 = arith.constant dense<0.000000e+00> : vector<16x32xf32>
    %313 = tpu.matmul %312, %311, %cst_108 {dimension_numbers = #tpu.dot_dimension_numbers<[1], [0], [0], [1], [0, 0, 1, 1], [], []>} : vector<16x32xbf16>, vector<32x32xbf16>, vector<16x32xf32> -> vector<16x32xf32>
    %c0_109 = arith.constant 0 : index
    %c0_110 = arith.constant 0 : index
    %314 = vector.load %arg20[%c0_109, %c0_110] : memref<1x32xf32, #tpu.memory_space<vmem>>, vector<1x32xf32>
    %315 = vector.broadcast %314 : vector<1x32xf32> to vector<16x32xf32>
    %316 = arith.addf %313, %315 : vector<16x32xf32>
    %317 = arith.addf %205, %316 : vector<16x32xf32>
    %cst_111 = arith.constant dense<0.000000e+00> : vector<16xf32>
    %318 = vector.multi_reduction <add>, %317, %cst_111 [1] : vector<16x32xf32> to vector<16xf32>
    %319 = vector.shape_cast %318 : vector<16xf32> to vector<16x1xf32>
    %cst_112 = arith.constant 3.200000e+01 : f32
    %320 = vector.broadcast %cst_112 : f32 to vector<16x1xf32>
    %321 = arith.divf %319, %320 : vector<16x1xf32>
    %322 = vector.broadcast %321 : vector<16x1xf32> to vector<16x32xf32>
    %323 = arith.subf %317, %322 : vector<16x32xf32>
    %324 = arith.mulf %323, %323 : vector<16x32xf32>
    %cst_113 = arith.constant dense<0.000000e+00> : vector<16xf32>
    %325 = vector.multi_reduction <add>, %324, %cst_113 [1] : vector<16x32xf32> to vector<16xf32>
    %326 = vector.shape_cast %325 : vector<16xf32> to vector<16x1xf32>
    %cst_114 = arith.constant 3.200000e+01 : f32
    %327 = vector.broadcast %cst_114 : f32 to vector<16x1xf32>
    %328 = arith.divf %326, %327 : vector<16x1xf32>
    %329 = vector.broadcast %321 : vector<16x1xf32> to vector<16x32xf32>
    %330 = arith.subf %317, %329 : vector<16x32xf32>
    %cst_115 = arith.constant 9.99999996E-13 : f32
    %331 = vector.broadcast %cst_115 : f32 to vector<16x1xf32>
    %332 = arith.addf %328, %331 : vector<16x1xf32>
    %333 = math.rsqrt %332 : vector<16x1xf32>
    %334 = vector.broadcast %333 : vector<16x1xf32> to vector<16x32xf32>
    %335 = arith.mulf %330, %334 : vector<16x32xf32>
    %c0_116 = arith.constant 0 : index
    %c0_117 = arith.constant 0 : index
    %336 = vector.load %arg21[%c0_116, %c0_117] : memref<1x32xf32, #tpu.memory_space<vmem>>, vector<1x32xf32>
    %337 = vector.broadcast %336 : vector<1x32xf32> to vector<16x32xf32>
    %338 = arith.mulf %335, %337 : vector<16x32xf32>
    %c0_118 = arith.constant 0 : index
    %c0_119 = arith.constant 0 : index
    %339 = vector.load %arg22[%c0_118, %c0_119] : memref<1x32xf32, #tpu.memory_space<vmem>>, vector<1x32xf32>
    %340 = vector.broadcast %339 : vector<1x32xf32> to vector<16x32xf32>
    %341 = arith.addf %338, %340 : vector<16x32xf32>
    %c0_120 = arith.constant 0 : index
    %c0_121 = arith.constant 0 : index
    %342 = vector.load %arg23[%c0_120, %c0_121] : memref<32x64xbf16, #tpu.memory_space<vmem>>, vector<32x64xbf16>
    %343 = arith.truncf %341 : vector<16x32xf32> to vector<16x32xbf16>
    %cst_122 = arith.constant dense<0.000000e+00> : vector<16x64xf32>
    %344 = tpu.matmul %343, %342, %cst_122 {dimension_numbers = #tpu.dot_dimension_numbers<[1], [0], [0], [1], [0, 0, 1, 1], [], []>} : vector<16x32xbf16>, vector<32x64xbf16>, vector<16x64xf32> -> vector<16x64xf32>
    %c0_123 = arith.constant 0 : index
    %c0_124 = arith.constant 0 : index
    %345 = vector.load %arg24[%c0_123, %c0_124] : memref<1x64xf32, #tpu.memory_space<vmem>>, vector<1x64xf32>
    %346 = vector.broadcast %345 : vector<1x64xf32> to vector<16x64xf32>
    %347 = arith.addf %344, %346 : vector<16x64xf32>
    %cst_125 = arith.constant 5.000000e-01 : f32
    %348 = vector.broadcast %cst_125 : f32 to vector<16x64xf32>
    %349 = arith.mulf %348, %347 : vector<16x64xf32>
    %cst_126 = arith.constant 0.707106769 : f32
    %350 = vector.broadcast %cst_126 : f32 to vector<16x64xf32>
    %351 = arith.mulf %347, %350 : vector<16x64xf32>
    %352 = math.erf %351 : vector<16x64xf32>
    %cst_127 = arith.constant 1.000000e+00 : f32
    %353 = vector.broadcast %cst_127 : f32 to vector<16x64xf32>
    %354 = arith.addf %353, %352 : vector<16x64xf32>
    %355 = arith.mulf %349, %354 : vector<16x64xf32>
    %c0_128 = arith.constant 0 : index
    %c0_129 = arith.constant 0 : index
    %356 = vector.load %arg25[%c0_128, %c0_129] : memref<64x32xbf16, #tpu.memory_space<vmem>>, vector<64x32xbf16>
    %357 = arith.truncf %355 : vector<16x64xf32> to vector<16x64xbf16>
    %cst_130 = arith.constant dense<0.000000e+00> : vector<16x32xf32>
    %358 = tpu.matmul %357, %356, %cst_130 {dimension_numbers = #tpu.dot_dimension_numbers<[1], [0], [0], [1], [0, 0, 1, 1], [], []>} : vector<16x64xbf16>, vector<64x32xbf16>, vector<16x32xf32> -> vector<16x32xf32>
    %c0_131 = arith.constant 0 : index
    %c0_132 = arith.constant 0 : index
    %359 = vector.load %arg26[%c0_131, %c0_132] : memref<1x32xf32, #tpu.memory_space<vmem>>, vector<1x32xf32>
    %360 = vector.broadcast %359 : vector<1x32xf32> to vector<16x32xf32>
    %361 = arith.addf %358, %360 : vector<16x32xf32>
    %362 = arith.addf %341, %361 : vector<16x32xf32>
    %cst_133 = arith.constant dense<0.000000e+00> : vector<16xf32>
    %363 = vector.multi_reduction <add>, %362, %cst_133 [1] : vector<16x32xf32> to vector<16xf32>
    %364 = vector.shape_cast %363 : vector<16xf32> to vector<16x1xf32>
    %cst_134 = arith.constant 3.200000e+01 : f32
    %365 = vector.broadcast %cst_134 : f32 to vector<16x1xf32>
    %366 = arith.divf %364, %365 : vector<16x1xf32>
    %367 = vector.broadcast %366 : vector<16x1xf32> to vector<16x32xf32>
    %368 = arith.subf %362, %367 : vector<16x32xf32>
    %369 = arith.mulf %368, %368 : vector<16x32xf32>
    %cst_135 = arith.constant dense<0.000000e+00> : vector<16xf32>
    %370 = vector.multi_reduction <add>, %369, %cst_135 [1] : vector<16x32xf32> to vector<16xf32>
    %371 = vector.shape_cast %370 : vector<16xf32> to vector<16x1xf32>
    %cst_136 = arith.constant 3.200000e+01 : f32
    %372 = vector.broadcast %cst_136 : f32 to vector<16x1xf32>
    %373 = arith.divf %371, %372 : vector<16x1xf32>
    %374 = vector.broadcast %366 : vector<16x1xf32> to vector<16x32xf32>
    %375 = arith.subf %362, %374 : vector<16x32xf32>
    %cst_137 = arith.constant 9.99999996E-13 : f32
    %376 = vector.broadcast %cst_137 : f32 to vector<16x1xf32>
    %377 = arith.addf %373, %376 : vector<16x1xf32>
    %378 = math.rsqrt %377 : vector<16x1xf32>
    %379 = vector.broadcast %378 : vector<16x1xf32> to vector<16x32xf32>
    %380 = arith.mulf %375, %379 : vector<16x32xf32>
    %c0_138 = arith.constant 0 : index
    %c0_139 = arith.constant 0 : index
    %381 = vector.load %arg27[%c0_138, %c0_139] : memref<1x32xf32, #tpu.memory_space<vmem>>, vector<1x32xf32>
    %382 = vector.broadcast %381 : vector<1x32xf32> to vector<16x32xf32>
    %383 = arith.mulf %380, %382 : vector<16x32xf32>
    %c0_140 = arith.constant 0 : index
    %c0_141 = arith.constant 0 : index
    %384 = vector.load %arg28[%c0_140, %c0_141] : memref<1x32xf32, #tpu.memory_space<vmem>>, vector<1x32xf32>
    %385 = vector.broadcast %384 : vector<1x32xf32> to vector<16x32xf32>
    %386 = arith.addf %383, %385 : vector<16x32xf32>
    %c0_142 = arith.constant 0 : index
    %c0_143 = arith.constant 0 : index
    %387 = vector.load %arg31[%c0_142, %c0_143] : memref<16x32xf32, #tpu.memory_space<vmem>>, vector<16x32xf32>
    tpu.vector_store %arg31[%c0_142, %c0_143], %386 {strides = array<i32>} : memref<16x32xf32, #tpu.memory_space<vmem>>, vector<16x32xf32>,
    %388 = vector.extract_strided_slice %386 {offsets = [0, 0], sizes = [1, 32], strides = [1, 1]} : vector<16x32xf32> to vector<1x32xf32>
    %389 = vector.extract_strided_slice %386 {offsets = [8, 0], sizes = [1, 32], strides = [1, 1]} : vector<16x32xf32> to vector<1x32xf32>
    %390 = tpu.concatenate %388, %389 in 0 : vector<1x32xf32>, vector<1x32xf32> -> vector<2x32xf32>
    %c0_144 = arith.constant 0 : index
    %c0_145 = arith.constant 0 : index
    %391 = vector.load %arg29[%c0_144, %c0_145] : memref<32x2xbf16, #tpu.memory_space<vmem>>, vector<32x2xbf16>
    %392 = arith.truncf %390 : vector<2x32xf32> to vector<2x32xbf16>
    %cst_146 = arith.constant dense<0.000000e+00> : vector<2x2xf32>
    %393 = tpu.matmul %392, %391, %cst_146 {dimension_numbers = #tpu.dot_dimension_numbers<[1], [0], [0], [1], [0, 0, 1, 1], [], []>} : vector<2x32xbf16>, vector<32x2xbf16>, vector<2x2xf32> -> vector<2x2xf32>
    %c0_147 = arith.constant 0 : index
    %c0_148 = arith.constant 0 : index
    %394 = vector.load %arg30[%c0_147, %c0_148] : memref<1x2xf32, #tpu.memory_space<vmem>>, vector<1x2xf32>
    %395 = vector.broadcast %394 : vector<1x2xf32> to vector<2x2xf32>
    %396 = arith.addf %393, %395 : vector<2x2xf32>
    %c0_149 = arith.constant 0 : index
    %c0_150 = arith.constant 0 : index
    %397 = vector.load %arg32[%c0_149, %c0_150] : memref<2x2xf32, #tpu.memory_space<vmem>>, vector<2x2xf32>
    tpu.vector_store %arg32[%c0_149, %c0_150], %396 {strides = array<i32>} : memref<2x2xf32, #tpu.memory_space<vmem>>, vector<2x2xf32>,
    return
  }
  func.func @transform_0(%arg0: i32) -> (i32, i32) {
    %c0_i32 = arith.constant 0 : i32
    %c0_i32_0 = arith.constant 0 : i32
    %c0_i32_1 = arith.constant 0 : i32
    return %c0_i32, %c0_i32_0 : i32, i32
  }
  func.func @transform_1(%arg0: i32) -> (i32, i32, i32) {
    %c0_i32 = arith.constant 0 : i32
    %c0_i32_0 = arith.constant 0 : i32
    %c0_i32_1 = arith.constant 0 : i32
    %c0_i32_2 = arith.constant 0 : i32
    return %c0_i32, %c0_i32_0, %c0_i32_1 : i32, i32, i32
  }
  func.func @transform_2(%arg0: i32) -> (i32, i32) {
    %c0_i32 = arith.constant 0 : i32
    %c0_i32_0 = arith.constant 0 : i32
    %c0_i32_1 = arith.constant 0 : i32
    return %c0_i32, %c0_i32_0 : i32, i32
  }
  func.func @transform_3(%arg0: i32) -> (i32, i32) {
    %c0_i32 = arith.constant 0 : i32
    %c0_i32_0 = arith.constant 0 : i32
    %c0_i32_1 = arith.constant 0 : i32
    return %c0_i32, %c0_i32_0 : i32, i32
  }
  func.func @transform_4(%arg0: i32) -> (i32, i32) {
    %c0_i32 = arith.constant 0 : i32
    %c0_i32_0 = arith.constant 0 : i32
    %c0_i32_1 = arith.constant 0 : i32
    return %c0_i32, %c0_i32_0 : i32, i32
  }
  func.func @transform_5(%arg0: i32) -> (i32, i32) {
    %c0_i32 = arith.constant 0 : i32
    %c0_i32_0 = arith.constant 0 : i32
    %c0_i32_1 = arith.constant 0 : i32
    return %c0_i32, %c0_i32_0 : i32, i32
  }
  func.func @transform_6(%arg0: i32) -> (i32, i32) {
    %c0_i32 = arith.constant 0 : i32
    %c0_i32_0 = arith.constant 0 : i32
    %c0_i32_1 = arith.constant 0 : i32
    return %c0_i32, %c0_i32_0 : i32, i32
  }
  func.func @transform_7(%arg0: i32) -> (i32, i32) {
    %c0_i32 = arith.constant 0 : i32
    %c0_i32_0 = arith.constant 0 : i32
    %c0_i32_1 = arith.constant 0 : i32
    return %c0_i32, %c0_i32_0 : i32, i32
  }
  func.func @transform_8(%arg0: i32) -> (i32, i32) {
    %c0_i32 = arith.constant 0 : i32
    %c0_i32_0 = arith.constant 0 : i32
    %c0_i32_1 = arith.constant 0 : i32
    return %c0_i32, %c0_i32_0 : i32, i32
  }
  func.func @transform_9(%arg0: i32) -> (i32, i32) {
    %c0_i32 = arith.constant 0 : i32
    %c0_i32_0 = arith.constant 0 : i32
    %c0_i32_1 = arith.constant 0 : i32
    return %c0_i32, %c0_i32_0 : i32, i32
  }
  func.func @transform_10(%arg0: i32) -> (i32, i32) {
    %c0_i32 = arith.constant 0 : i32
    %c0_i32_0 = arith.constant 0 : i32
    %c0_i32_1 = arith.constant 0 : i32
    return %c0_i32, %c0_i32_0 : i32, i32
  }
  func.func @transform_11(%arg0: i32) -> (i32, i32) {
    %c0_i32 = arith.constant 0 : i32
    %c0_i32_0 = arith.constant 0 : i32
    %c0_i32_1 = arith.constant 0 : i32
    return %c0_i32, %c0_i32_0 : i32, i32
  }
  func.func @transform_12(%arg0: i32) -> (i32, i32) {
    %c0_i32 = arith.constant 0 : i32
    %c0_i32_0 = arith.constant 0 : i32
    %c0_i32_1 = arith.constant 0 : i32
    return %c0_i32, %c0_i32_0 : i32, i32
  }
  func.func @transform_13(%arg0: i32) -> (i32, i32) {
    %c0_i32 = arith.constant 0 : i32
    %c0_i32_0 = arith.constant 0 : i32
    %c0_i32_1 = arith.constant 0 : i32
    return %c0_i32, %c0_i32_0 : i32, i32
  }
  func.func @transform_14(%arg0: i32) -> (i32, i32) {
    %c0_i32 = arith.constant 0 : i32
    %c0_i32_0 = arith.constant 0 : i32
    %c0_i32_1 = arith.constant 0 : i32
    return %c0_i32, %c0_i32_0 : i32, i32
  }
  func.func @transform_15(%arg0: i32) -> (i32, i32) {
    %c0_i32 = arith.constant 0 : i32
    %c0_i32_0 = arith.constant 0 : i32
    %c0_i32_1 = arith.constant 0 : i32
    return %c0_i32, %c0_i32_0 : i32, i32
  }
  func.func @transform_16(%arg0: i32) -> (i32, i32) {
    %c0_i32 = arith.constant 0 : i32
    %c0_i32_0 = arith.constant 0 : i32
    %c0_i32_1 = arith.constant 0 : i32
    return %c0_i32, %c0_i32_0 : i32, i32
  }
  func.func @transform_17(%arg0: i32) -> (i32, i32) {
    %c0_i32 = arith.constant 0 : i32
    %c0_i32_0 = arith.constant 0 : i32
    %c0_i32_1 = arith.constant 0 : i32
    return %c0_i32, %c0_i32_0 : i32, i32
  }
  func.func @transform_18(%arg0: i32) -> (i32, i32) {
    %c0_i32 = arith.constant 0 : i32
    %c0_i32_0 = arith.constant 0 : i32
    %c0_i32_1 = arith.constant 0 : i32
    return %c0_i32, %c0_i32_0 : i32, i32
  }
  func.func @transform_19(%arg0: i32) -> (i32, i32) {
    %c0_i32 = arith.constant 0 : i32
    %c0_i32_0 = arith.constant 0 : i32
    %c0_i32_1 = arith.constant 0 : i32
    return %c0_i32, %c0_i32_0 : i32, i32
  }
  func.func @transform_20(%arg0: i32) -> (i32, i32) {
    %c0_i32 = arith.constant 0 : i32
    %c0_i32_0 = arith.constant 0 : i32
    %c0_i32_1 = arith.constant 0 : i32
    return %c0_i32, %c0_i32_0 : i32, i32
  }
  func.func @transform_21(%arg0: i32) -> (i32, i32) {
    %c0_i32 = arith.constant 0 : i32
    %c0_i32_0 = arith.constant 0 : i32
    %c0_i32_1 = arith.constant 0 : i32
    return %c0_i32, %c0_i32_0 : i32, i32
  }
  func.func @transform_22(%arg0: i32) -> (i32, i32) {
    %c0_i32 = arith.constant 0 : i32
    %c0_i32_0 = arith.constant 0 : i32
    %c0_i32_1 = arith.constant 0 : i32
    return %c0_i32, %c0_i32_0 : i32, i32
  }
  func.func @transform_23(%arg0: i32) -> (i32, i32) {
    %c0_i32 = arith.constant 0 : i32
    %c0_i32_0 = arith.constant 0 : i32
    %c0_i32_1 = arith.constant 0 : i32
    return %c0_i32, %c0_i32_0 : i32, i32
  }
  func.func @transform_24(%arg0: i32) -> (i32, i32) {
    %c0_i32 = arith.constant 0 : i32
    %c0_i32_0 = arith.constant 0 : i32
    %c0_i32_1 = arith.constant 0 : i32
    return %c0_i32, %c0_i32_0 : i32, i32
  }
  func.func @transform_25(%arg0: i32) -> (i32, i32) {
    %c0_i32 = arith.constant 0 : i32
    %c0_i32_0 = arith.constant 0 : i32
    %c0_i32_1 = arith.constant 0 : i32
    return %c0_i32, %c0_i32_0 : i32, i32
  }
  func.func @transform_26(%arg0: i32) -> (i32, i32) {
    %c0_i32 = arith.constant 0 : i32
    %c0_i32_0 = arith.constant 0 : i32
    %c0_i32_1 = arith.constant 0 : i32
    return %c0_i32, %c0_i32_0 : i32, i32
  }
  func.func @transform_27(%arg0: i32) -> (i32, i32) {
    %c0_i32 = arith.constant 0 : i32
    %c0_i32_0 = arith.constant 0 : i32
    %c0_i32_1 = arith.constant 0 : i32
    return %c0_i32, %c0_i32_0 : i32, i32
  }
  func.func @transform_28(%arg0: i32) -> (i32, i32) {
    %c0_i32 = arith.constant 0 : i32
    %c0_i32_0 = arith.constant 0 : i32
    %c0_i32_1 = arith.constant 0 : i32
    return %c0_i32, %c0_i32_0 : i32, i32
  }
  func.func @transform_29(%arg0: i32) -> (i32, i32) {
    %c0_i32 = arith.constant 0 : i32
    %c0_i32_0 = arith.constant 0 : i32
    %c0_i32_1 = arith.constant 0 : i32
    return %c0_i32, %c0_i32_0 : i32, i32
  }
  func.func @transform_30(%arg0: i32) -> (i32, i32) {
    %c0_i32 = arith.constant 0 : i32
    %c0_i32_0 = arith.constant 0 : i32
    %c0_i32_1 = arith.constant 0 : i32
    return %c0_i32, %c0_i32_0 : i32, i32
  }
  func.func @transform_31(%arg0: i32) -> (i32, i32) {
    %c0_i32 = arith.constant 0 : i32
    %c0_i32_0 = arith.constant 0 : i32
    %c0_i32_1 = arith.constant 0 : i32
    return %c0_i32, %c0_i32_0 : i32, i32
  }
}

</mosaic_0001>

<bundles_post_ra>
// kernel: text_classification_forward.1
= control target key start
LH: loop header
LB: loop body
LE: loop exit
PB: predicated region body
PF: predicated region fallthrough
CT: control target
= control target key end

     0   :  { %s2523_s6 = smov 1   ;;  %s2524_s10 = smov 2   ;;  %s3037_s0 = inlined_call_operand.smem [shape: u32[32], index: -1, kind: input, shape index: {}] }
   0x1   :  { %s2574_s5 = sld [smem:[%s3037_s0]]   ;;  %s2525_s14 = smov 3  }
   0x2   :  { %s2579_s9 = sld [smem:[%s3037_s0 + %s2523_s6]]   ;;  %s2526_s18 = smov 4  }
   0x3   :  { %s2584_s13 = sld [smem:[%s3037_s0 + %s2524_s10]]   ;;  %s2527_s22 = smov 5  }
   0x4   :  { %s2589_s17 = sld [smem:[%s3037_s0 + %s2525_s14]]   ;;  %s2528_s26 = smov 6  }
   0x5   :  { %s2594_s21 = sld [smem:[%s3037_s0 + %s2526_s18]]   ;;  %s2529_s30 = smov 7  }
   0x6   :  { %s2599_s25 = sld [smem:[%s3037_s0 + %s2527_s22]]   ;;  %s2530_s4 = smov 8  }
   0x7   :  { %s2604_s29 = sld [smem:[%s3037_s0 + %s2528_s26]]   ;;  %s2531_s10 = smov 9  }
   0x8   :  { %s2609_s3 = sld [smem:[%s3037_s0 + %s2529_s30]]   ;;  %s2532_s15 = smov 10  }
   0x9   :  { %s2614_s8 = sld [smem:[%s3037_s0 + %s2530_s4]]   ;;  %s2533_s20 = smov 11  }
   0xa   :  { %s2619_s14 = sld [smem:[%s3037_s0 + %s2531_s10]]   ;;  %s2534_s26 = smov 12  }
   0xb   :  { %s2624_s19 = sld [smem:[%s3037_s0 + %s2532_s15]]   ;;  %s2535_s1 = smov 13  }
   0xc   :  { %s2629_s24 = sld [smem:[%s3037_s0 + %s2533_s20]]   ;;  %s2536_s7 = smov 14  }
   0xd   :  { %s2634_s30 = sld [smem:[%s3037_s0 + %s2534_s26]]   ;;  %s2537_s15 = smov 15  }
   0xe   :  { %s2639_s6 = sld [smem:[%s3037_s0 + %s2535_s1]]   ;;  %s2538_s22 = smov 16  }
   0xf   :  { %s2644_s12 = sld [smem:[%s3037_s0 + %s2536_s7]]   ;;  %s2539_s28 = smov 17  }
  0x10   :  { %s2649_s20 = sld [smem:[%s3037_s0 + %s2537_s15]]   ;;  %s2540_s7 = smov 18  }
  0x11   :  { %s2654_s27 = sld [smem:[%s3037_s0 + %s2538_s22]]   ;;  %s2541_s15 = smov 19  }
  0x12   :  { %s2659_s4 = sld [smem:[%s3037_s0 + %s2539_s28]]   ;;  %s2542_s22 = smov 20  }
  0x13   :  { %s2543_s28 = smov 21  }
  0x15   :  { %3042 = sst [smem:[#allocation8_spill]] %s2644_s12 }
  0x16   :  { %3043 = sst [smem:[#allocation9_spill]] %s2649_s20 }
  0x17   :  { %3044 = sst [smem:[#allocation10_spill]] %s2654_s27 }
  0x18   :  { %3045 = sst [smem:[#allocation11_spill]] %s2659_s4 }
  0x19   :  { %s2664_s12 = sld [smem:[%s3037_s0 + %s2540_s7]]   ;;  %s2544_s7 = smov 22  }
  0x1a   :  { %s2669_s20 = sld [smem:[%s3037_s0 + %s2541_s15]]   ;;  %s2545_s15 = smov 23  }
  0x1b   :  { %s2674_s27 = sld [smem:[%s3037_s0 + %s2542_s22]]   ;;  %s2546_s22 = smov 24  }
  0x1c   :  { %s2679_s4 = sld [smem:[%s3037_s0 + %s2543_s28]]   ;;  %s2547_s28 = smov 25  }
  0x1f   :  { %3046 = sst [smem:[#allocation12_spill]] %s2664_s12 }
  0x20   :  { %3047 = sst [smem:[#allocation13_spill]] %s2669_s20 }
  0x21   :  { %3048 = sst [smem:[#allocation14_spill]] %s2674_s27 }
  0x22   :  { %3049 = sst [smem:[#allocation15_spill]] %s2679_s4 }
  0x23   :  { %s2684_s12 = sld [smem:[%s3037_s0 + %s2544_s7]]   ;;  %s2548_s7 = smov 26  }
  0x24   :  { %s2689_s20 = sld [smem:[%s3037_s0 + %s2545_s15]]   ;;  %s2549_s15 = smov 27  }
  0x25   :  { %s2694_s27 = sld [smem:[%s3037_s0 + %s2546_s22]]   ;;  %s2550_s22 = smov 28  }
  0x26   :  { %s2699_s4 = sld [smem:[%s3037_s0 + %s2547_s28]]   ;;  %s2551_s28 = smov 29  }
  0x29   :  { %3050 = sst [smem:[#allocation16_spill]] %s2684_s12 }
  0x2a   :  { %3051 = sst [smem:[#allocation17_spill]] %s2689_s20 }
  0x2b   :  { %3052 = sst [smem:[#allocation18_spill]] %s2694_s27 }
  0x2c   :  { %3053 = sst [smem:[#allocation19_spill]] %s2699_s4 }
  0x2d   :  { %s2704_s12 = sld [smem:[%s3037_s0 + %s2548_s7]]   ;;  %s2552_s7 = smov 30  }
  0x2e   :  { %s2709_s20 = sld [smem:[%s3037_s0 + %s2549_s15]]   ;;  %s2553_s15 = smov 31  }
  0x2f   :  { %s2714_s27 = sld [smem:[%s3037_s0 + %s2550_s22]]  }
  0x30   :  { %s2719_s4 = sld [smem:[%s3037_s0 + %s2551_s28]]  }
  0x33   :  { %3054 = sst [smem:[#allocation20_spill]] %s2704_s12 }
  0x34   :  { %3055 = sst [smem:[#allocation21_spill]] %s2709_s20 }
  0x35   :  { %s2724_s12 = sld [smem:[%s3037_s0 + %s2552_s7]]  }
  0x36   :  { %s2729_s20 = sld [smem:[%s3037_s0 + %s2553_s15]]  }
  0x37   :  { %69 = vsyncpa [#allocation3], 0  ;;  %v132_v0 = vld [vmem:[%s2574_s5] sm:$0xff]  ;;  %vm134_vm0 = vcmask 261120   ;;  %v133_v1 = vld [vmem:[%s2574_s5 + $0x8] sm:$0xff] }
  0x38   :  { %v135_v2 = vsel %vm134_vm0, %v132_v0, 0.0  ;;  %v138_v3 = vsel %vm134_vm0, %v133_v1, 0.0 }
  0x39   :  { %136 = vadd.xlane.f32.xlu0 %v135_v2 }
  0x3d   :  { %139 = vadd.xlane.f32.xlu0 %v138_v3 }
  0x3e   :  { %70 = vsyncpa [#allocation5], 0  ;;  %v2393_v14 = vld [vmem:[%s2594_s21] sm:$0xff]   ;;  %v2554_v15 = vmov 0.0   ;;  %v2394_v16 = vld [vmem:[%s2594_s21 + $0x8] sm:$0xff]   ;;  %vm2555_vm1 = vmmov 0  }
  0x3f   :  { %2164 = vmatprep.subr.bf16.mxu0 %v2554_v15  ;;  %2172 = vmatprep.subr.bf16.mxu1 %v2554_v15  ;;  %v2032_v25 = vld [vmem:[%s2584_s13] ss:$0 sm:$0xff]  ;;  %s2556_s0 = smov 80   ;;  %s2557_s5 = smov 96   ;;  %vm253_vm2 = vcmask 130048   ;;  %vm308_vm3 = vcmask 64512  }
  0x40   :  { %2165 = vmatpush3.bf16.msra.mxu0 %v2393_v14  ;;  %2168 = vmatprep.mubr.msk.bf16.mxu0 %vm2555_vm1, %v2554_v15  ;;  %v2033_v29 = vld [vmem:[%s2589_s17] ss:$0 sm:$0xff]  ;;  %s2558_s13 = smov 112   ;;  %s2560_s17 = smov 64   ;;  %vm326_vm4 = vcmask 1043456   ;;  %vm956_vm5 = vcmask 523264  }
  0x41   :  { %2166 = vmatprep.subr.bf16.mxu0 %v2554_v15  ;;  %2174 = vmatprep.mubr.msk.bf16.mxu1 %vm2555_vm1, %v2554_v15  ;;  %v2034_v34 = vld [vmem:[%s2599_s25] ss:$0 sm:$0xff]  ;;  %s2561_s21 = smov 16   ;;  %s3056_s25 = sld [smem:[#allocation10_spill]]  ;;  %vm1900_vm6 = vcmask 1040384  }
  0x42   :  { %v2798_v54 = vld [vmem:[%s2579_s9] ss:$0 sm:$0xff]  ;;  %s3065_s22 = sld [smem:[#allocation18_spill]]  ;;  %s3066_s23 = sld [smem:[#allocation17_spill]] }
  0x43   :  { %s3067_s26 = sld [smem:[#allocation19_spill]]  ;;  %s3068_s28 = sld [smem:[#allocation20_spill]] }
  0x44   :  { %2167 = vmatpush3.bf16.msra.mxu0 %v2394_v16  ;;  %s3069_s1 = sld [smem:[#allocation21_spill]] }
  0x45   :  { %2178 = vmatprep.subr.bf16.mxu0 %v2554_v15 }
  0xc6   :  { %v137_v4 = vpop.xlane.xlu0 %136 }
  0xc7   :  { %v142_v5 = vmul.f32 0.03125, %v137_v4 }
  0xc9   :  { %v144_v6 = vsub.f32 %v132_v0, %v142_v5  ;;  %v2805_v5 = vld [vmem:[%s2579_s9 + $0x1] ss:$0 sm:$0xff]  ;;  %s2559_s9 = smov 48  }
  0xca   :  { %v140_v7 = vpop.xlane.xlu0 %139 }
  0xcb   :  { %v143_v8 = vmul.f32 0.03125, %v140_v7  ;;  %v146_v9 = vmul.f32 %v144_v6, %v144_v6 }
  0xcd   :  { %v145_v10 = vsub.f32 %v133_v1, %v143_v8  ;;  %v148_v11 = vsel %vm134_vm0, %v146_v9, 0.0 }
  0xce   :  { %149 = vadd.xlane.f32.xlu1 %v148_v11 }
  0xcf   :  { %v147_v12 = vmul.f32 %v145_v10, %v145_v10 }
  0xd1   :  { %v151_v13 = vsel %vm134_vm0, %v147_v12, 0.0 }
  0xd2   :  { %152 = vadd.xlane.f32.xlu1 %v151_v13 }
 0x15b   :  { %v150_v17 = vpop.xlane.xlu1 %149 }
 0x15c   :  { %v154_v18 = vmul.f32 0.03125, %v150_v17 }
 0x15e   :  { %v156_v19 = vadd.f32 1e-12, %v154_v18 }
 0x15f   :  { %v153_v20 = vpop.xlane.xlu1 %152 }
 0x160   :  { %2415 = vrsqrt.f32 %v156_v19  ;;  %v155_v21 = vmul.f32 0.03125, %v153_v20 }
 0x162   :  { %v157_v22 = vadd.f32 1e-12, %v155_v21 }
 0x164   :  { %2417 = vrsqrt.f32 %v157_v22 }
 0x16a   :  { %v2416_v23 = vpop.eup %2415 }
 0x16b   :  { %v160_v24 = vmul.f32 %v2416_v23, %v144_v6 }
 0x16d   :  { %v169_v28 = vmul.f32 %v2032_v25, %v160_v24 }
 0x16e   :  { %v2418_v26 = vpop.eup %2417 }
 0x16f   :  { %v161_v27 = vmul.f32 %v2418_v26, %v145_v10  ;;  %v2749_v31 = vadd.f32 %v2033_v29, %v169_v28 }
 0x171   :  { %v170_v30 = vmul.f32 %v2032_v25, %v161_v27 }
 0x173   :  { %v2751_v32 = vadd.f32 %v2033_v29, %v170_v30 }
 0x175   :  { %v184_v33 = vpack.c.bf16 %v2751_v32, %v2749_v31 }
 0x177   :  { %2169 = vmatmul.mubr.msk.bf16.vlgmr.msra.gmra.mrb[0].mxu0 %vm134_vm0, %v184_v33 }
 0x178   :  { %2180 = vmatprep.mubr.msk.bf16.mxu0 %vm2555_vm1, %v2554_v15 }
 0x24a   :  { %v241_v35 = vpop.f32.mrb[0].mxu0 }
 0x24b   :  { %v242_v36 = vadd.f32 %v2034_v34, %v241_v35  ;;  %v2170_v37 = vpop.f32.mrb[1].mxu0 }
 0x24c   :  { %v244_v38 = vpop.f32.mrb[2].mxu0 }
 0x24d   :  { %v2759_v39 = vpack.c.bf16 %v242_v36, %v242_v36  ;;  %v245_v40 = vadd.f32 %v2034_v34, %v244_v38  ;;  %v2171_v41 = vpop.f32.mrb[3].mxu0 }
 0x24f   :  { %372 = vrot.lane.b32.xlu1 %v2759_v39, %s2556_s0  ;;  %251 = vrot.lane.b32.xlu0 %v2759_v39, %s2557_s5  ;;  %v2765_v42 = vpack.c.bf16 %v245_v40, %v245_v40 }
 0x253   :  { %370 = vrot.lane.b32.xlu1 %v2759_v39, %s2558_s13  ;;  %609 = vrot.lane.b32.xlu0 %v2765_v42, %s2556_s0 }
 0x257   :  { %491 = vrot.lane.b32.xlu1 %v2765_v42, %s2557_s5 }
 0x25b   :  { %607 = vrot.lane.b32.xlu1 %v2765_v42, %s2558_s13 }
 0x2c1   :  { %v252_v43 = vpop.permute.xlu0 %251  ;;  %v373_v45 = vpop.permute.xlu1 %372 }
 0x2c2   :  { %v258_v44 = vsel %vm253_vm2, %v252_v43, 0  ;;  %v378_v47 = vsel %vm253_vm2, %v373_v45, 0 }
 0x2c3   :  { %2173 = vmatpush3.bf16.xpose.msra.mxu1 %v258_v44 }
 0x2c4   :  { %2184 = vmatprep.subr.bf16.mxu1 %v2554_v15 }
 0x2c5   :  { %v371_v46 = vpop.permute.xlu1 %370  ;;  %v610_v50 = vpop.permute.xlu0 %609 }
 0x2c6   :  { %v615_v51 = vsel %vm253_vm2, %v610_v50, 0 }
 0x2c9   :  { %v492_v48 = vpop.permute.xlu1 %491 }
 0x2ca   :  { %2175 = vmatmul.mubr.msk.bf16.vlgmr.msra.gmra.mrb[0].mxu1 %vm253_vm2, %v2759_v39  ;;  %v497_v49 = vsel %vm253_vm2, %v492_v48, 0 }
 0x2cb   :  { %2185 = vmatpush3.bf16.xpose.msra.mxu1 %v378_v47  ;;  %2186 = vmatprep.mubr.msk.bf16.mxu1 %vm2555_vm1, %v2554_v15 }
 0x2cc   :  { %2196 = vmatprep.subr.bf16.mxu1 %v2554_v15 }
 0x2cd   :  { %v608_v52 = vpop.permute.xlu1 %607 }
 0x2d2   :  { %2187 = vmatmul.mubr.msk.bf16.vlgmr.msra.gmra.mrb[4].mxu1 %vm253_vm2, %v371_v46 }
 0x2d3   :  { %2197 = vmatpush3.bf16.xpose.msra.mxu1 %v497_v49  ;;  %2198 = vmatprep.mubr.msk.bf16.mxu1 %vm2555_vm1, %v2554_v15 }
 0x2d4   :  { %2208 = vmatprep.subr.bf16.mxu1 %v2554_v15 }
 0x2da   :  { %2199 = vmatmul.mubr.msk.bf16.vlgmr.msra.gmra.mrb[8].mxu1 %vm253_vm2, %v2765_v42 }
 0x2db   :  { %2209 = vmatpush3.bf16.xpose.msra.mxu1 %v615_v51  ;;  %2210 = vmatprep.mubr.msk.bf16.mxu1 %vm2555_vm1, %v2554_v15 }
 0x2dc   :  { %2220 = vmatprep.subr.bf16.mxu1 %v2554_v15 }
 0x2e2   :  { %2211 = vmatmul.mubr.msk.bf16.vlgmr.msra.gmra.mrb[12].mxu1 %vm253_vm2, %v608_v52 }
 0x2e3   :  { %2224 = vmatprep.mubr.msk.bf16.mxu1 %vm2555_vm1, %v2554_v15 }
 0x39d   :  { %v294_v53 = vpop.f32.mrb[0].mxu1 }
 0x39e   :  { %v300_v55 = vmul.f32 0.25, %v294_v53  ;;  %v2176_v56 = vpop.f32.mrb[1].mxu1 }
 0x39f   :  { %v297_v57 = vpop.f32.mrb[2].mxu1 }
 0x3a0   :  { %v2177_v58 = vpop.f32.mrb[3].mxu1  ;;  %v307_v59 = vadd.f32 %v2798_v54, %v300_v55 }
 0x3a2   :  { %v309_v60 = vsel %vm308_vm3, %v307_v59, -inf }
 0x3a3   :  { %310 = vmax.xlane.f32.xlu0 %v309_v60 }
 0x3a5   :  { %v414_v61 = vpop.f32.mrb[4].mxu1 }
 0x3a6   :  { %v420_v62 = vmul.f32 0.25, %v414_v61  ;;  %v2188_v63 = vpop.f32.mrb[5].mxu1 }
 0x3a7   :  { %v417_v0 = vpop.f32.mrb[6].mxu1 }
 0x3a8   :  { %v2189_v1 = vpop.f32.mrb[7].mxu1  ;;  %v421_v2 = vadd.f32 %v2798_v54, %v420_v62 }
 0x3aa   :  { %v422_v3 = vsel %vm308_vm3, %v421_v2, -inf }
 0x3ab   :  { %423 = vmax.xlane.f32.xlu1 %v422_v3  ;;  %v2395_v3 = vld [vmem:[%s2604_s29] sm:$0xff]  }
 0x3ac   :  { %2221 = vmatpush3.bf16.msra.mxu1 %v2395_v3 }
 0x3ad   :  { %v533_v4 = vpop.f32.mrb[8].mxu1  ;;  %2222 = vmatprep.subr.bf16.mxu1 %v2554_v15 }
 0x3ae   :  { %v539_v6 = vmul.f32 0.25, %v533_v4  ;;  %v2200_v7 = vpop.f32.mrb[9].mxu1 }
 0x3af   :  { %v536_v8 = vpop.f32.mrb[10].mxu1 }
 0x3b0   :  { %v2201_v9 = vpop.f32.mrb[11].mxu1  ;;  %v546_v10 = vadd.f32 %v2805_v5, %v539_v6 }
 0x3b2   :  { %v547_v11 = vsel %vm308_vm3, %v546_v10, -inf }
 0x3b3   :  { %548 = vmax.xlane.f32.xlu0 %v547_v11 }
 0x3b5   :  { %v651_v12 = vpop.f32.mrb[12].mxu1 }
 0x3b6   :  { %v657_v13 = vmul.f32 0.25, %v651_v12  ;;  %v2212_v14 = vpop.f32.mrb[13].mxu1 }
 0x3b7   :  { %v654_v16 = vpop.f32.mrb[14].mxu1 }
 0x3b8   :  { %v2213_v17 = vpop.f32.mrb[15].mxu1  ;;  %v658_v18 = vadd.f32 %v2805_v5, %v657_v13 }
 0x3ba   :  { %v659_v19 = vsel %vm308_vm3, %v658_v18, -inf }
 0x3bb   :  { %660 = vmax.xlane.f32.xlu0 %v659_v19 }
 0x430   :  { %v311_v20 = vpop.xlane.xlu0 %310 }
 0x431   :  { %v312_v21 = vsub.f32 %v307_v59, %v311_v20 }
 0x433   :  { %v313_v22 = vmul.f32 1.442695, %v312_v21 }
 0x435   :  { %2419 = vpow2.f32 %v313_v22 }
 0x438   :  { %v424_v23 = vpop.xlane.xlu1 %423 }
 0x439   :  { %v425_v24 = vsub.f32 %v421_v2, %v424_v23 }
 0x43b   :  { %v426_v25 = vmul.f32 1.442695, %v425_v24 }
 0x43d   :  { %2421 = vpow2.f32 %v426_v25 }
 0x43f   :  { %v2420_v26 = vpop.eup %2419 }
 0x440   :  { %v549_v27 = vpop.xlane.xlu0 %548  ;;  %v315_v28 = vsel %vm308_vm3, %v2420_v26, 0.0 }
 0x441   :  { %v550_v29 = vsub.f32 %v546_v10, %v549_v27  ;;  %316 = vadd.xlane.f32.xlu0 %v315_v28 }
 0x443   :  { %v551_v30 = vmul.f32 1.442695, %v550_v29 }
 0x445   :  { %2423 = vpow2.f32 %v551_v30  ;;  %v2049_v30 = vld [vmem:[%s2609_s3] ss:$0 sm:$0xff]  ;;  %s3058_s3 = sld [smem:[#allocation9_spill]] }
 0x447   :  { %v2422_v33 = vpop.eup %2421 }
 0x448   :  { %v428_v34 = vsel %vm308_vm3, %v2422_v33, 0.0  ;;  %v661_v37 = vpop.xlane.xlu0 %660 }
 0x449   :  { %429 = vadd.xlane.f32.xlu1 %v428_v34  ;;  %v662_v38 = vsub.f32 %v658_v18, %v661_v37  ;;  %v2396_v18 = vld [vmem:[%s2604_s29 + $0x8] sm:$0xff]   ;;  %s3057_s29 = sld [smem:[#allocation8_spill]] }
 0x44a   :  { %2223 = vmatpush3.bf16.msra.mxu1 %v2396_v18 }
 0x44b   :  { %v663_v40 = vmul.f32 1.442695, %v662_v38  ;;  %2236 = vmatprep.subr.bf16.mxu1 %v2554_v15 }
 0x44d   :  { %2425 = vpow2.f32 %v663_v40 }
 0x44f   :  { %v2424_v35 = vpop.eup %2423 }
 0x450   :  { %v553_v36 = vsel %vm308_vm3, %v2424_v35, 0.0 }
 0x451   :  { %554 = vadd.xlane.f32.xlu0 %v553_v36 }
 0x457   :  { %v2426_v41 = vpop.eup %2425 }
 0x458   :  { %v665_v43 = vsel %vm308_vm3, %v2426_v41, 0.0 }
 0x45a   :  { %434 = vrot.lane.b32.xlu1 %v2759_v39, %s2559_s9 }
 0x45e   :  { %559 = vrot.lane.b32.xlu1 %v2765_v42, %s2560_s17 }
 0x467   :  { %321 = vrot.lane.b32.xlu0 %v2759_v39, %s2560_s17 }
 0x482   :  { %666 = vadd.xlane.f32.xlu1 %v665_v43 }
 0x493   :  { %671 = vrot.lane.b32.xlu1 %v2765_v42, %s2559_s9 }
 0x4ce   :  { %v317_v44 = vpop.xlane.xlu0 %316 }
 0x4cf   :  { %2427 = vrcp.f32 %v317_v44 }
 0x4d6   :  { %v430_v45 = vpop.xlane.xlu1 %429 }
 0x4d7   :  { %2429 = vrcp.f32 %v430_v45 }
 0x4d9   :  { %v2428_v46 = vpop.eup %2427 }
 0x4da   :  { %v319_v48 = vmul.f32 %v2428_v46, %v2420_v26  ;;  %v435_v50 = vpop.permute.xlu1 %434 }
 0x4db   :  { %v440_v42 = vsel %vm326_vm4, %v435_v50, 0 }
 0x4dc   :  { %v320_v51 = vpack.c.bf16 %v319_v48, %v319_v48 }
 0x4de   :  { %v555_v47 = vpop.xlane.xlu0 %554  ;;  %v560_v55 = vpop.permute.xlu1 %559 }
 0x4df   :  { %2431 = vrcp.f32 %v555_v47  ;;  %v565_v58 = vsel %vm326_vm4, %v560_v55, 0 }
 0x4e1   :  { %v2430_v52 = vpop.eup %2429 }
 0x4e2   :  { %v322_v39 = vpop.permute.xlu0 %321  ;;  %v432_v53 = vmul.f32 %v2430_v52, %v2422_v33 }
 0x4e3   :  { %v328_v49 = vsel %vm326_vm4, %v322_v39, 0 }
 0x4e4   :  { %2179 = vmatpush3.bf16.msra.mxu0 %v328_v49  ;;  %v433_v56 = vpack.c.bf16 %v432_v53, %v432_v53 }
 0x4e5   :  { %2190 = vmatprep.subr.bf16.mxu0 %v2554_v15 }
 0x4e7   :  { %2181 = vmatmul.mubr.msk.bf16.vlgmr.msra.gmra.mrb[4].mxu0 %vm308_vm3, %v320_v51 }
 0x4e8   :  { %2191 = vmatpush3.bf16.msra.mxu0 %v440_v42  ;;  %2192 = vmatprep.mubr.msk.bf16.mxu0 %vm2555_vm1, %v2554_v15  ;;  %v2398_v42 = vld [vmem:[%s2624_s19 + $0x8] sm:$0xff]  }
 0x4e9   :  { %2202 = vmatprep.subr.bf16.mxu0 %v2554_v15  ;;  %v2432_v57 = vpop.eup %2431 }
 0x4ea   :  { %v557_v59 = vmul.f32 %v2432_v57, %v2424_v35 }
 0x4ec   :  { %v558_v60 = vpack.c.bf16 %v557_v59, %v557_v59 }
 0x4ef   :  { %2193 = vmatmul.mubr.msk.bf16.vlgmr.msra.gmra.mrb[8].mxu0 %vm308_vm3, %v433_v56 }
 0x4f0   :  { %2203 = vmatpush3.bf16.msra.mxu0 %v565_v58  ;;  %2204 = vmatprep.mubr.msk.bf16.mxu0 %vm2555_vm1, %v2554_v15 }
 0x4f1   :  { %2214 = vmatprep.subr.bf16.mxu0 %v2554_v15 }
 0x4f7   :  { %2205 = vmatmul.mubr.msk.bf16.vlgmr.msra.gmra.mrb[12].mxu0 %vm308_vm3, %v558_v60 }
 0x4f8   :  { %2216 = vmatprep.mubr.msk.bf16.mxu0 %vm2555_vm1, %v2554_v15 }
 0x50f   :  { %v667_v61 = vpop.xlane.xlu1 %666 }
 0x510   :  { %2433 = vrcp.f32 %v667_v61 }
 0x513   :  { %v672_v62 = vpop.permute.xlu1 %671 }
 0x514   :  { %v677_v63 = vsel %vm326_vm4, %v672_v62, 0  ;;  %v2053_v62 = vld [vmem:[%s2614_s8] ss:$0 sm:$0xff]  ;;  %s3059_s8 = sld [smem:[#allocation11_spill]] }
 0x515   :  { %2215 = vmatpush3.bf16.msra.mxu0 %v677_v63 }
 0x516   :  { %2228 = vmatprep.subr.bf16.mxu0 %v2554_v15 }
 0x51a   :  { %v2434_v0 = vpop.eup %2433 }
 0x51b   :  { %v669_v1 = vmul.f32 %v2434_v0, %v2426_v41 }
 0x51d   :  { %v670_v2 = vpack.c.bf16 %v669_v1, %v669_v1 }
 0x51f   :  { %2217 = vmatmul.mubr.msk.bf16.vlgmr.msra.gmra.mrb[16].mxu0 %vm308_vm3, %v670_v2  ;;  %v2054_v2 = vld [vmem:[%s2619_s14] ss:$0 sm:$0xff]  ;;  %s3060_s14 = sld [smem:[#allocation12_spill]] }
 0x520   :  { %2232 = vmatprep.mubr.msk.bf16.mxu0 %vm2555_vm1, %v2554_v15 }
 0x5ba   :  { %v364_v4 = vpop.f32.mrb[4].mxu0 }
 0x5bb   :  { %v2182_v6 = vpop.f32.mrb[5].mxu0 }
 0x5bc   :  { %v367_v7 = vpop.f32.mrb[6].mxu0 }
 0x5bd   :  { %v2183_v8 = vpop.f32.mrb[7].mxu0 }
 0x5be   :  { %v2399_v8 = vld [vmem:[%s2634_s30] sm:$0xff]  }
 0x5c2   :  { %v476_v9 = vpop.f32.mrb[8].mxu0 }
 0x5c3   :  { %v2194_v10 = vpop.f32.mrb[9].mxu0 }
 0x5c4   :  { %v479_v11 = vpop.f32.mrb[10].mxu0  ;;  %v2401_v10 = vld [vmem:[%s2634_s30 + $0x10] sm:$0xff]  }
 0x5c5   :  { %v2195_v12 = vpop.f32.mrb[11].mxu0  ;;  %v2402_v11 = vld [vmem:[%s2634_s30 + $0x18] sm:$0xff]  }
 0x5c6   :  { %v2055_v12 = vld [vmem:[%s2629_s24] ss:$0 sm:$0xff]  ;;  %s3062_s24 = sld [smem:[#allocation16_spill]] }
 0x5ca   :  { %v601_v13 = vpop.f32.mrb[12].mxu0 }
 0x5cb   :  { %v2206_v14 = vpop.f32.mrb[13].mxu0 }
 0x5cc   :  { %v604_v16 = vpop.f32.mrb[14].mxu0 }
 0x5cd   :  { %v2207_v17 = vpop.f32.mrb[15].mxu0 }
 0x5f2   :  { %v713_v19 = vpop.f32.mrb[16].mxu0 }
 0x5f3   :  { %v2383_v20 = vpack.i.bf16 %v713_v19, %v476_v9  ;;  %v2218_v21 = vpop.f32.mrb[17].mxu0  ;;  %v2400_v9 = vld [vmem:[%s2634_s30 + $0x8] sm:$0xff]   ;;  %s3063_s30 = sld [smem:[#allocation14_spill]] }
 0x5f4   :  { %v716_v22 = vpop.f32.mrb[18].mxu0 }
 0x5f5   :  { %2384 = vrot.lane.b32.xlu0 %v2383_v20, %s2561_s21  ;;  %v2219_v23 = vpop.f32.mrb[19].mxu0 }
 0x667   :  { %v2385_v24 = vpop.permute.xlu0 %2384 }
 0x668   :  { %v2387_v25 = vunpack.i.h.bf16 %v2385_v24  ;;  %v2386_v26 = vunpack.i.l.bf16 %v2385_v24 }
 0x66a   :  { %v723_v27 = vsel %vm253_vm2, %v601_v13, %v2387_v25  ;;  %v486_v28 = vsel %vm253_vm2, %v364_v4, %v2386_v26 }
 0x66b   :  { %v728_v29 = vpack.c.bf16 %v723_v27, %v486_v28 }
 0x66d   :  { %2225 = vmatmul.mubr.msk.bf16.vlgmr.msra.gmra.mrb[16].mxu1 %vm134_vm0, %v728_v29 }
 0x66e   :  { %2244 = vmatprep.mubr.msk.bf16.mxu1 %vm2555_vm1, %v2554_v15  ;;  %2237 = vmatpush3.bf16.msra.mxu1 %v2399_v8 }
 0x66f   :  { %2238 = vmatprep.subr.bf16.mxu1 %v2554_v15 }
 0x672   :  { %2239 = vmatpush3.bf16.msra.mxu1 %v2400_v9  ;;  %v2067_v9 = vld [vmem:[%s3059_s8] ss:$0 sm:$0xff] }
 0x673   :  { %2240 = vmatprep.subr.bf16.mxu1 %v2554_v15 }
 0x676   :  { %2241 = vmatpush3.bf16.msra.mxu1 %v2401_v10 }
 0x677   :  { %2242 = vmatprep.subr.bf16.mxu1 %v2554_v15 }
 0x67a   :  { %2243 = vmatpush3.bf16.msra.mxu1 %v2402_v11 }
 0x67b   :  { %2262 = vmatprep.subr.bf16.mxu1 %v2554_v15 }
 0x740   :  { %v785_v33 = vpop.f32.mrb[16].mxu1 }
 0x741   :  { %v786_v34 = vadd.f32 %v2049_v30, %v785_v33  ;;  %v2226_v35 = vpop.f32.mrb[17].mxu1  ;;  %v2059_v33 = vld [vmem:[%s2639_s6] ss:$0 sm:$0xff]  ;;  %s3064_s6 = sld [smem:[#allocation15_spill]] }
 0x742   :  { %v788_v36 = vpop.f32.mrb[18].mxu1 }
 0x743   :  { %v789_v37 = vadd.f32 %v2049_v30, %v788_v36  ;;  %v2227_v38 = vpop.f32.mrb[19].mxu1  ;;  %v792_v40 = vadd.f32 %v786_v34, %v2749_v31 }
 0x745   :  { %v794_v41 = vsel %vm134_vm0, %v792_v40, 0.0  ;;  %v793_v43 = vadd.f32 %v789_v37, %v2751_v32  ;;  %v2397_v32 = vld [vmem:[%s2624_s19] sm:$0xff]   ;;  %s3061_s19 = sld [smem:[#allocation13_spill]] }
 0x746   :  { %795 = vadd.xlane.f32.xlu1 %v794_v41  ;;  %2229 = vmatpush3.bf16.msra.mxu0 %v2397_v32 }
 0x747   :  { %v797_v44 = vsel %vm134_vm0, %v793_v43, 0.0  ;;  %2230 = vmatprep.subr.bf16.mxu0 %v2554_v15 }
 0x748   :  { %798 = vadd.xlane.f32.xlu0 %v797_v44 }
 0x74a   :  { %2231 = vmatpush3.bf16.msra.mxu0 %v2398_v42  ;;  %v2403_v42 = vld [vmem:[%s3056_s25] sm:$0xff]  }
 0x74b   :  { %2248 = vmatprep.subr.bf16.mxu0 %v2554_v15 }
 0x7d3   :  { %v796_v45 = vpop.xlane.xlu1 %795 }
 0x7d4   :  { %v800_v46 = vmul.f32 0.03125, %v796_v45 }
 0x7d5   :  { %v799_v47 = vpop.xlane.xlu0 %798 }
 0x7d6   :  { %v802_v48 = vsub.f32 %v792_v40, %v800_v46  ;;  %v801_v39 = vmul.f32 0.03125, %v799_v47 }
 0x7d8   :  { %v803_v49 = vsub.f32 %v793_v43, %v801_v39  ;;  %v804_v50 = vmul.f32 %v802_v48, %v802_v48 }
 0x7da   :  { %v806_v51 = vsel %vm134_vm0, %v804_v50, 0.0  ;;  %v805_v31 = vmul.f32 %v803_v49, %v803_v49 }
 0x7db   :  { %807 = vadd.xlane.f32.xlu0 %v806_v51 }
 0x7dc   :  { %v809_v52 = vsel %vm134_vm0, %v805_v31, 0.0 }
 0x7df   :  { %810 = vadd.xlane.f32.xlu0 %v809_v52 }
 0x868   :  { %v808_v53 = vpop.xlane.xlu0 %807 }
 0x869   :  { %v812_v55 = vmul.f32 0.03125, %v808_v53  ;;  %v2404_v53 = vld [vmem:[%s3056_s25 + $0x8] sm:$0xff]  }
 0x86b   :  { %v814_v56 = vadd.f32 1e-12, %v812_v55 }
 0x86c   :  { %v811_v57 = vpop.xlane.xlu0 %810 }
 0x86d   :  { %2435 = vrsqrt.f32 %v814_v56  ;;  %v813_v58 = vmul.f32 0.03125, %v811_v57 }
 0x86f   :  { %v815_v59 = vadd.f32 1e-12, %v813_v58 }
 0x871   :  { %2437 = vrsqrt.f32 %v815_v59 }
 0x877   :  { %v2436_v60 = vpop.eup %2435 }
 0x878   :  { %v818_v61 = vmul.f32 %v2436_v60, %v802_v48 }
 0x87a   :  { %v827_v0 = vmul.f32 %v2053_v62, %v818_v61 }
 0x87b   :  { %v2438_v63 = vpop.eup %2437 }
 0x87c   :  { %v819_v1 = vmul.f32 %v2438_v63, %v803_v49  ;;  %v836_v4 = vadd.f32 %v2054_v2, %v827_v0 }
 0x87e   :  { %v828_v3 = vmul.f32 %v2053_v62, %v819_v1  ;;  %v2065_v62 = vld [vmem:[%s3057_s29] ss:$0 sm:$0xff] }
 0x880   :  { %v837_v6 = vadd.f32 %v2054_v2, %v828_v3  ;;  %v2066_v3 = vld [vmem:[%s3058_s3] ss:$0 sm:$0xff] }
 0x882   :  { %v842_v7 = vpack.c.bf16 %v837_v6, %v836_v4 }
 0x884   :  { %2233 = vmatmul.mubr.msk.bf16.vlgmr.msra.gmra.mrb[20].mxu0 %vm134_vm0, %v842_v7 }
 0x885   :  { %2252 = vmatprep.mubr.msk.bf16.mxu0 %vm2555_vm1, %v2554_v15  ;;  %2249 = vmatpush3.bf16.msra.mxu0 %v2403_v42 }
 0x886   :  { %2250 = vmatprep.subr.bf16.mxu0 %v2554_v15 }
 0x889   :  { %2251 = vmatpush3.bf16.msra.mxu0 %v2404_v53 }
 0x88a   :  { %2256 = vmatprep.subr.bf16.mxu0 %v2554_v15 }
 0x957   :  { %v899_v13 = vpop.f32.mrb[20].mxu0 }
 0x958   :  { %v900_v14 = vadd.f32 %v2055_v12, %v899_v13  ;;  %v2234_v16 = vpop.f32.mrb[21].mxu0 }
 0x959   :  { %v902_v17 = vpop.f32.mrb[22].mxu0 }
 0x95a   :  { %v908_v18 = vmul.f32 0.70710677, %v900_v14  ;;  %v903_v19 = vadd.f32 %v2055_v12, %v902_v17  ;;  %v2235_v20 = vpop.f32.mrb[23].mxu0  ;;  %v906_v25 = vmul.f32 0.5, %v900_v14 }
 0x95c   :  { %2439 = verf.f32 %v908_v18  ;;  %v909_v21 = vmul.f32 0.70710677, %v903_v19  ;;  %v907_v26 = vmul.f32 0.5, %v903_v19 }
 0x95e   :  { %2441 = verf.f32 %v909_v21 }
 0x966   :  { %v2440_v22 = vpop.eup %2439 }
 0x967   :  { %v912_v23 = vadd.f32 1.0, %v2440_v22 }
 0x968   :  { %v2442_v24 = vpop.eup %2441 }
 0x969   :  { %v913_v27 = vadd.f32 1.0, %v2442_v24  ;;  %v914_v28 = vmul.f32 %v912_v23, %v906_v25 }
 0x96b   :  { %v915_v29 = vmul.f32 %v913_v27, %v907_v26 }
 0x96d   :  { %v924_v30 = vpack.c.bf16 %v915_v29, %v914_v28 }
 0x96f   :  { %2245 = vmatmul.mubr.msk.bf16.vlgmr.msra.gmra.mrb[20].mxu1 %vm956_vm5, %v924_v30 }
 0x970   :  { %2264 = vmatprep.mubr.msk.bf16.mxu1 %vm2555_vm1, %v2554_v15 }
 0xa42   :  { %v994_v34 = vpop.f32.mrb[20].mxu1 }
 0xa43   :  { %v995_v35 = vadd.f32 %v2059_v33, %v994_v34  ;;  %v2246_v36 = vpop.f32.mrb[21].mxu1 }
 0xa44   :  { %v997_v37 = vpop.f32.mrb[22].mxu1 }
 0xa45   :  { %v998_v38 = vadd.f32 %v2059_v33, %v997_v37  ;;  %v2247_v40 = vpop.f32.mrb[23].mxu1  ;;  %v1001_v41 = vadd.f32 %v995_v35, %v836_v4 }
 0xa47   :  { %v1003_v43 = vsel %vm134_vm0, %v1001_v41, 0.0  ;;  %v1002_v44 = vadd.f32 %v998_v38, %v837_v6 }
 0xa48   :  { %1004 = vadd.xlane.f32.xlu1 %v1003_v43 }
 0xa49   :  { %v1006_v45 = vsel %vm134_vm0, %v1002_v44, 0.0 }
 0xa4a   :  { %1007 = vadd.xlane.f32.xlu0 %v1006_v45 }
 0xad5   :  { %v1005_v46 = vpop.xlane.xlu1 %1004 }
 0xad6   :  { %v1009_v47 = vmul.f32 0.03125, %v1005_v46 }
 0xad7   :  { %v1008_v48 = vpop.xlane.xlu0 %1007 }
 0xad8   :  { %v1011_v39 = vsub.f32 %v1001_v41, %v1009_v47  ;;  %v1010_v49 = vmul.f32 0.03125, %v1008_v48 }
 0xada   :  { %v1012_v50 = vsub.f32 %v1002_v44, %v1010_v49  ;;  %v1013_v51 = vmul.f32 %v1011_v39, %v1011_v39 }
 0xadc   :  { %v1015_v31 = vsel %vm134_vm0, %v1013_v51, 0.0  ;;  %v1014_v52 = vmul.f32 %v1012_v50, %v1012_v50 }
 0xadd   :  { %1016 = vadd.xlane.f32.xlu1 %v1015_v31 }
 0xade   :  { %v1018_v32 = vsel %vm134_vm0, %v1014_v52, 0.0 }
 0xadf   :  { %1019 = vadd.xlane.f32.xlu0 %v1018_v32 }
 0xb6a   :  { %v1017_v55 = vpop.xlane.xlu1 %1016 }
 0xb6b   :  { %v1021_v56 = vmul.f32 0.03125, %v1017_v55 }
 0xb6c   :  { %v1020_v57 = vpop.xlane.xlu0 %1019 }
 0xb6d   :  { %v1023_v58 = vadd.f32 1e-12, %v1021_v56  ;;  %v1022_v59 = vmul.f32 0.03125, %v1020_v57 }
 0xb6f   :  { %2443 = vrsqrt.f32 %v1023_v58  ;;  %v1024_v60 = vadd.f32 1e-12, %v1022_v59 }
 0xb71   :  { %2445 = vrsqrt.f32 %v1024_v60 }
 0xb79   :  { %v2444_v61 = vpop.eup %2443 }
 0xb7a   :  { %v1027_v63 = vmul.f32 %v2444_v61, %v1011_v39 }
 0xb7b   :  { %v2446_v0 = vpop.eup %2445 }
 0xb7c   :  { %v1036_v1 = vmul.f32 %v2065_v62, %v1027_v63  ;;  %v1028_v2 = vmul.f32 %v2446_v0, %v1012_v50 }
 0xb7e   :  { %v1037_v4 = vmul.f32 %v2065_v62, %v1028_v2  ;;  %v2892_v6 = vadd.f32 %v2066_v3, %v1036_v1 }
 0xb80   :  { %v2894_v7 = vadd.f32 %v2066_v3, %v1037_v4 }
 0xb82   :  { %v1051_v8 = vpack.c.bf16 %v2894_v7, %v2892_v6 }
 0xb84   :  { %2253 = vmatmul.mubr.msk.bf16.vlgmr.msra.gmra.mrb[24].mxu0 %vm134_vm0, %v1051_v8 }
 0xb85   :  { %2258 = vmatprep.mubr.msk.bf16.mxu0 %vm2555_vm1, %v2554_v15 }
 0xc57   :  { %v1108_v10 = vpop.f32.mrb[24].mxu0 }
 0xc58   :  { %v1109_v11 = vadd.f32 %v2067_v9, %v1108_v10  ;;  %v2254_v12 = vpop.f32.mrb[25].mxu0 }
 0xc59   :  { %v1111_v13 = vpop.f32.mrb[26].mxu0 }
 0xc5a   :  { %v2902_v14 = vpack.c.bf16 %v1109_v11, %v1109_v11  ;;  %v1112_v16 = vadd.f32 %v2067_v9, %v1111_v13  ;;  %v2255_v17 = vpop.f32.mrb[27].mxu0 }
 0xc5c   :  { %1229 = vrot.lane.b32.xlu0 %v2902_v14, %s2556_s0  ;;  %1117 = vrot.lane.b32.xlu1 %v2902_v14, %s2557_s5  ;;  %v2908_v18 = vpack.c.bf16 %v1112_v16, %v1112_v16 }
 0xc60   :  { %1227 = vrot.lane.b32.xlu1 %v2902_v14, %s2558_s13  ;;  %1456 = vrot.lane.b32.xlu0 %v2908_v18, %s2558_s13 }
 0xc64   :  { %1346 = vrot.lane.b32.xlu1 %v2908_v18, %s2557_s5 }
 0xc68   :  { %1458 = vrot.lane.b32.xlu1 %v2908_v18, %s2556_s0 }
 0xcce   :  { %v1118_v19 = vpop.permute.xlu1 %1117  ;;  %v1230_v21 = vpop.permute.xlu0 %1229 }
 0xccf   :  { %v1123_v20 = vsel %vm253_vm2, %v1118_v19, 0  ;;  %v1235_v23 = vsel %vm253_vm2, %v1230_v21, 0 }
 0xcd0   :  { %2257 = vmatpush3.bf16.xpose.msra.mxu0 %v1123_v20 }
 0xcd1   :  { %2268 = vmatprep.subr.bf16.mxu0 %v2554_v15 }
 0xcd2   :  { %v1228_v22 = vpop.permute.xlu1 %1227  ;;  %v1457_v28 = vpop.permute.xlu0 %1456 }
 0xcd6   :  { %v1347_v24 = vpop.permute.xlu1 %1346 }
 0xcd7   :  { %2259 = vmatmul.mubr.msk.bf16.vlgmr.msra.gmra.mrb[28].mxu0 %vm253_vm2, %v2902_v14  ;;  %v1352_v25 = vsel %vm253_vm2, %v1347_v24, 0 }
 0xcd8   :  { %2269 = vmatpush3.bf16.xpose.msra.mxu0 %v1235_v23  ;;  %2270 = vmatprep.mubr.msk.bf16.mxu0 %vm2555_vm1, %v2554_v15 }
 0xcd9   :  { %2280 = vmatprep.subr.bf16.mxu0 %v2554_v15 }
 0xcda   :  { %v1459_v26 = vpop.permute.xlu1 %1458 }
 0xcdb   :  { %v1464_v27 = vsel %vm253_vm2, %v1459_v26, 0 }
 0xcdf   :  { %2271 = vmatmul.mubr.msk.bf16.vlgmr.msra.gmra.mrb[32].mxu0 %vm253_vm2, %v1228_v22 }
 0xce0   :  { %2281 = vmatpush3.bf16.xpose.msra.mxu0 %v1352_v25  ;;  %2282 = vmatprep.mubr.msk.bf16.mxu0 %vm2555_vm1, %v2554_v15 }
 0xce1   :  { %2292 = vmatprep.subr.bf16.mxu0 %v2554_v15 }
 0xce7   :  { %2283 = vmatmul.mubr.msk.bf16.vlgmr.msra.gmra.mrb[36].mxu0 %vm253_vm2, %v2908_v18 }
 0xce8   :  { %2293 = vmatpush3.bf16.xpose.msra.mxu0 %v1464_v27  ;;  %2294 = vmatprep.mubr.msk.bf16.mxu0 %vm2555_vm1, %v2554_v15 }
 0xce9   :  { %2304 = vmatprep.subr.bf16.mxu0 %v2554_v15 }
 0xcef   :  { %2295 = vmatmul.mubr.msk.bf16.vlgmr.msra.gmra.mrb[40].mxu0 %vm253_vm2, %v1457_v28 }
 0xcf0   :  { %2308 = vmatprep.mubr.msk.bf16.mxu0 %vm2555_vm1, %v2554_v15 }
 0xdaa   :  { %v1159_v29 = vpop.f32.mrb[28].mxu0 }
 0xdab   :  { %v1165_v30 = vmul.f32 0.25, %v1159_v29  ;;  %v2260_v33 = vpop.f32.mrb[29].mxu0 }
 0xdac   :  { %v1162_v34 = vpop.f32.mrb[30].mxu0 }
 0xdad   :  { %v2261_v35 = vpop.f32.mrb[31].mxu0  ;;  %v1166_v36 = vadd.f32 %v2798_v54, %v1165_v30 }
 0xdaf   :  { %v1167_v37 = vsel %vm308_vm3, %v1166_v36, -inf }
 0xdb0   :  { %1168 = vmax.xlane.f32.xlu1 %v1167_v37 }
 0xdb2   :  { %v1271_v38 = vpop.f32.mrb[32].mxu0 }
 0xdb3   :  { %v1277_v40 = vmul.f32 0.25, %v1271_v38  ;;  %v2272_v41 = vpop.f32.mrb[33].mxu0 }
 0xdb4   :  { %v1274_v43 = vpop.f32.mrb[34].mxu0 }
 0xdb5   :  { %v2273_v44 = vpop.f32.mrb[35].mxu0  ;;  %v1278_v45 = vadd.f32 %v2798_v54, %v1277_v40 }
 0xdb6   :  { %v2405_v44 = vld [vmem:[%s3060_s14] sm:$0xff]  }
 0xdb7   :  { %v1279_v46 = vsel %vm308_vm3, %v1278_v45, -inf  ;;  %2305 = vmatpush3.bf16.msra.mxu0 %v2405_v44 }
 0xdb8   :  { %1280 = vmax.xlane.f32.xlu0 %v1279_v46  ;;  %2306 = vmatprep.subr.bf16.mxu0 %v2554_v15 }
 0xdba   :  { %v1388_v47 = vpop.f32.mrb[36].mxu0 }
 0xdbb   :  { %v1394_v48 = vmul.f32 0.25, %v1388_v47  ;;  %v2284_v39 = vpop.f32.mrb[37].mxu0 }
 0xdbc   :  { %v1391_v49 = vpop.f32.mrb[38].mxu0 }
 0xdbd   :  { %v2285_v50 = vpop.f32.mrb[39].mxu0  ;;  %v1395_v51 = vadd.f32 %v2805_v5, %v1394_v48 }
 0xdbf   :  { %v1396_v31 = vsel %vm308_vm3, %v1395_v51, -inf }
 0xdc0   :  { %1397 = vmax.xlane.f32.xlu0 %v1396_v31  ;;  %v2406_v31 = vld [vmem:[%s3060_s14 + $0x8] sm:$0xff]  }
 0xdc1   :  { %2307 = vmatpush3.bf16.msra.mxu0 %v2406_v31 }
 0xdc2   :  { %v1500_v52 = vpop.f32.mrb[40].mxu0  ;;  %2320 = vmatprep.subr.bf16.mxu0 %v2554_v15 }
 0xdc3   :  { %v1506_v32 = vmul.f32 0.25, %v1500_v52  ;;  %v2296_v42 = vpop.f32.mrb[41].mxu0 }
 0xdc4   :  { %v1503_v53 = vpop.f32.mrb[42].mxu0 }
 0xdc5   :  { %v2297_v55 = vpop.f32.mrb[43].mxu0  ;;  %v1507_v54 = vadd.f32 %v2805_v5, %v1506_v32 }
 0xdc7   :  { %v1508_v56 = vsel %vm308_vm3, %v1507_v54, -inf }
 0xdc8   :  { %1509 = vmax.xlane.f32.xlu0 %v1508_v56 }
 0xe3d   :  { %v1169_v57 = vpop.xlane.xlu1 %1168 }
 0xe3e   :  { %v1170_v58 = vsub.f32 %v1166_v36, %v1169_v57 }
 0xe40   :  { %v1171_v59 = vmul.f32 1.442695, %v1170_v58 }
 0xe42   :  { %2447 = vpow2.f32 %v1171_v59 }
 0xe45   :  { %v1281_v60 = vpop.xlane.xlu0 %1280 }
 0xe46   :  { %v1282_v61 = vsub.f32 %v1278_v45, %v1281_v60 }
 0xe48   :  { %v1283_v62 = vmul.f32 1.442695, %v1282_v61 }
 0xe4a   :  { %2449 = vpow2.f32 %v1283_v62 }
 0xe4c   :  { %v2448_v63 = vpop.eup %2447 }
 0xe4d   :  { %v1173_v0 = vsel %vm308_vm3, %v2448_v63, 0.0  ;;  %v1398_v1 = vpop.xlane.xlu0 %1397 }
 0xe4e   :  { %1174 = vadd.xlane.f32.xlu1 %v1173_v0  ;;  %v1399_v11 = vsub.f32 %v1395_v51, %v1398_v1  ;;  %v2079_v1 = vld [vmem:[%s3061_s19] ss:$0 sm:$0xff] }
 0xe50   :  { %v1400_v12 = vmul.f32 1.442695, %v1399_v11 }
 0xe54   :  { %v2450_v2 = vpop.eup %2449 }
 0xe55   :  { %v1510_v3 = vpop.xlane.xlu0 %1509  ;;  %v1285_v5 = vsel %vm308_vm3, %v2450_v2, 0.0 }
 0xe56   :  { %v1511_v4 = vsub.f32 %v1507_v54, %v1510_v3  ;;  %1286 = vadd.xlane.f32.xlu0 %v1285_v5 }
 0xe58   :  { %v1512_v8 = vmul.f32 1.442695, %v1511_v4 }
 0xe5a   :  { %2451 = vpow2.f32 %v1512_v8 }
 0xe5b   :  { %2453 = vpow2.f32 %v1400_v12 }
 0xe5f   :  { %1179 = vrot.lane.b32.xlu1 %v2902_v14, %s2560_s17 }
 0xe64   :  { %v2452_v9 = vpop.eup %2451 }
 0xe65   :  { %v1514_v10 = vsel %vm308_vm3, %v2452_v9, 0.0  ;;  %v2454_v13 = vpop.eup %2453 }
 0xe66   :  { %1515 = vadd.xlane.f32.xlu0 %v1514_v10  ;;  %v1402_v16 = vsel %vm308_vm3, %v2454_v13, 0.0 }
 0xe7c   :  { %1291 = vrot.lane.b32.xlu0 %v2902_v14, %s2559_s9 }
 0xe83   :  { %1403 = vadd.xlane.f32.xlu1 %v1402_v16 }
 0xe94   :  { %1408 = vrot.lane.b32.xlu1 %v2908_v18, %s2560_s17 }
 0xe98   :  { %1520 = vrot.lane.b32.xlu1 %v2908_v18, %s2559_s9 }
 0xedb   :  { %v1175_v17 = vpop.xlane.xlu1 %1174 }
 0xedc   :  { %2455 = vrcp.f32 %v1175_v17 }
 0xedf   :  { %v1180_v19 = vpop.permute.xlu1 %1179 }
 0xee0   :  { %v1185_v20 = vsel %vm326_vm4, %v1180_v19, 0 }
 0xee1   :  { %2263 = vmatpush3.bf16.msra.mxu1 %v1185_v20 }
 0xee2   :  { %2274 = vmatprep.subr.bf16.mxu1 %v2554_v15 }
 0xee3   :  { %v1287_v14 = vpop.xlane.xlu0 %1286 }
 0xee4   :  { %2457 = vrcp.f32 %v1287_v14 }
 0xee6   :  { %v2456_v21 = vpop.eup %2455 }
 0xee7   :  { %v1177_v22 = vmul.f32 %v2456_v21, %v2448_v63 }
 0xee9   :  { %v1178_v23 = vpack.c.bf16 %v1177_v22, %v1177_v22 }
 0xeeb   :  { %2265 = vmatmul.mubr.msk.bf16.vlgmr.msra.gmra.mrb[24].mxu1 %vm308_vm3, %v1178_v23 }
 0xeec   :  { %2276 = vmatprep.mubr.msk.bf16.mxu1 %vm2555_vm1, %v2554_v15 }
 0xeee   :  { %v2458_v24 = vpop.eup %2457 }
 0xeef   :  { %v1289_v25 = vmul.f32 %v2458_v24, %v2450_v2 }
 0xef1   :  { %v1290_v28 = vpack.c.bf16 %v1289_v25, %v1289_v25 }
 0xef3   :  { %v1516_v18 = vpop.xlane.xlu0 %1515 }
 0xef7   :  { %v1292_v26 = vpop.permute.xlu0 %1291 }
 0xef8   :  { %v1297_v27 = vsel %vm326_vm4, %v1292_v26, 0 }
 0xef9   :  { %2275 = vmatpush3.bf16.msra.mxu1 %v1297_v27 }
 0xefa   :  { %2286 = vmatprep.subr.bf16.mxu1 %v2554_v15 }
 0xefc   :  { %2277 = vmatmul.mubr.msk.bf16.vlgmr.msra.gmra.mrb[28].mxu1 %vm308_vm3, %v1290_v28 }
 0xefd   :  { %2288 = vmatprep.mubr.msk.bf16.mxu1 %vm2555_vm1, %v2554_v15 }
 0xf10   :  { %v1404_v29 = vpop.xlane.xlu1 %1403 }
 0xf11   :  { %2459 = vrcp.f32 %v1404_v29 }
 0xf12   :  { %2461 = vrcp.f32 %v1516_v18  ;;  %v2408_v18 = vld [vmem:[%s3062_s24 + $0x8] sm:$0xff]  }
 0xf14   :  { %v1409_v30 = vpop.permute.xlu1 %1408 }
 0xf15   :  { %v1414_v33 = vsel %vm326_vm4, %v1409_v30, 0 }
 0xf16   :  { %2287 = vmatpush3.bf16.msra.mxu1 %v1414_v33 }
 0xf17   :  { %2298 = vmatprep.subr.bf16.mxu1 %v2554_v15 }
 0xf18   :  { %v1521_v36 = vpop.permute.xlu1 %1520 }
 0xf19   :  { %v1526_v40 = vsel %vm326_vm4, %v1521_v36, 0 }
 0xf1b   :  { %v2460_v34 = vpop.eup %2459 }
 0xf1c   :  { %v1406_v35 = vmul.f32 %v2460_v34, %v2454_v13  ;;  %v2462_v38 = vpop.eup %2461 }
 0xf1d   :  { %v1518_v41 = vmul.f32 %v2462_v38, %v2452_v9 }
 0xf1e   :  { %v1407_v37 = vpack.c.bf16 %v1406_v35, %v1406_v35  ;;  %v2083_v35 = vld [vmem:[%s3063_s30] ss:$0 sm:$0xff] }
 0xf1f   :  { %v1519_v43 = vpack.c.bf16 %v1518_v41, %v1518_v41 }
 0xf20   :  { %2289 = vmatmul.mubr.msk.bf16.vlgmr.msra.gmra.mrb[32].mxu1 %vm308_vm3, %v1407_v37 }
 0xf21   :  { %2299 = vmatpush3.bf16.msra.mxu1 %v1526_v40  ;;  %2300 = vmatprep.mubr.msk.bf16.mxu1 %vm2555_vm1, %v2554_v15  ;;  %v2084_v40 = vld [vmem:[%s3064_s6] ss:$0 sm:$0xff] }
 0xf22   :  { %2312 = vmatprep.subr.bf16.mxu1 %v2554_v15 }
 0xf28   :  { %2301 = vmatmul.mubr.msk.bf16.vlgmr.msra.gmra.mrb[36].mxu1 %vm308_vm3, %v1519_v43 }
 0xf29   :  { %2316 = vmatprep.mubr.msk.bf16.mxu1 %vm2555_vm1, %v2554_v15 }
 0xfbe   :  { %v1221_v45 = vpop.f32.mrb[24].mxu1 }
 0xfbf   :  { %v2266_v46 = vpop.f32.mrb[25].mxu1 }
 0xfc0   :  { %v1224_v47 = vpop.f32.mrb[26].mxu1  ;;  %v2409_v46 = vld [vmem:[%s3065_s22] sm:$0xff]  }
 0xfc1   :  { %v2267_v48 = vpop.f32.mrb[27].mxu1  ;;  %v2410_v47 = vld [vmem:[%s3065_s22 + $0x8] sm:$0xff]  }
 0xfc2   :  { %v2411_v48 = vld [vmem:[%s3065_s22 + $0x10] sm:$0xff]  }
 0xfcf   :  { %v1333_v39 = vpop.f32.mrb[28].mxu1 }
 0xfd0   :  { %v2278_v49 = vpop.f32.mrb[29].mxu1 }
 0xfd1   :  { %v1336_v50 = vpop.f32.mrb[30].mxu1  ;;  %v2085_v49 = vld [vmem:[%s3066_s23] ss:$0 sm:$0xff] }
 0xfd2   :  { %v2279_v51 = vpop.f32.mrb[31].mxu1 }
 0xff3   :  { %v1450_v52 = vpop.f32.mrb[32].mxu1 }
 0xff4   :  { %v2290_v32 = vpop.f32.mrb[33].mxu1 }
 0xff5   :  { %v1453_v42 = vpop.f32.mrb[34].mxu1 }
 0xff6   :  { %v2291_v53 = vpop.f32.mrb[35].mxu1 }
 0xffb   :  { %v1562_v55 = vpop.f32.mrb[36].mxu1 }
 0xffc   :  { %v2388_v54 = vpack.i.bf16 %v1562_v55, %v1333_v39  ;;  %v2302_v56 = vpop.f32.mrb[37].mxu1  ;;  %v2412_v39 = vld [vmem:[%s3065_s22 + $0x18] sm:$0xff]  }
 0xffd   :  { %v1565_v57 = vpop.f32.mrb[38].mxu1 }
 0xffe   :  { %2389 = vrot.lane.b32.xlu1 %v2388_v54, %s2561_s21  ;;  %v2303_v58 = vpop.f32.mrb[39].mxu1 }
0x1070   :  { %v2390_v59 = vpop.permute.xlu1 %2389 }
0x1071   :  { %v2392_v60 = vunpack.i.h.bf16 %v2390_v59  ;;  %v2391_v61 = vunpack.i.l.bf16 %v2390_v59 }
0x1073   :  { %v1572_v62 = vsel %vm253_vm2, %v1450_v52, %v2392_v60  ;;  %v1343_v63 = vsel %vm253_vm2, %v1221_v45, %v2391_v61 }
0x1074   :  { %v1577_v0 = vpack.c.bf16 %v1572_v62, %v1343_v63 }
0x1076   :  { %2309 = vmatmul.mubr.msk.bf16.vlgmr.msra.gmra.mrb[44].mxu0 %vm134_vm0, %v1577_v0  ;;  %v2089_v0 = vld [vmem:[%s3067_s26] ss:$0 sm:$0xff] }
0x1077   :  { %2328 = vmatprep.mubr.msk.bf16.mxu0 %vm2555_vm1, %v2554_v15  ;;  %2321 = vmatpush3.bf16.msra.mxu0 %v2409_v46 }
0x1078   :  { %2322 = vmatprep.subr.bf16.mxu0 %v2554_v15 }
0x107b   :  { %2323 = vmatpush3.bf16.msra.mxu0 %v2410_v47 }
0x107c   :  { %2324 = vmatprep.subr.bf16.mxu0 %v2554_v15 }
0x107f   :  { %2325 = vmatpush3.bf16.msra.mxu0 %v2411_v48 }
0x1080   :  { %2326 = vmatprep.subr.bf16.mxu0 %v2554_v15 }
0x1083   :  { %2327 = vmatpush3.bf16.msra.mxu0 %v2412_v39 }
0x1149   :  { %v1634_v2 = vpop.f32.mrb[44].mxu0 }
0x114a   :  { %v1635_v3 = vadd.f32 %v2079_v1, %v1634_v2  ;;  %v2310_v5 = vpop.f32.mrb[45].mxu0 }
0x114b   :  { %v1637_v4 = vpop.f32.mrb[46].mxu0 }
0x114c   :  { %v1638_v8 = vadd.f32 %v2079_v1, %v1637_v4  ;;  %v2311_v9 = vpop.f32.mrb[47].mxu0  ;;  %v1641_v10 = vadd.f32 %v1635_v3, %v2892_v6 }
0x114e   :  { %v1643_v11 = vsel %vm134_vm0, %v1641_v10, 0.0  ;;  %v1642_v12 = vadd.f32 %v1638_v8, %v2894_v7  ;;  %v2407_v7 = vld [vmem:[%s3062_s24] sm:$0xff]  }
0x114f   :  { %1644 = vadd.xlane.f32.xlu0 %v1643_v11  ;;  %2313 = vmatpush3.bf16.msra.mxu1 %v2407_v7  ;;  %v2414_v7 = vld [vmem:[%s2714_s27 + $0x8] sm:$0xff]  }
0x1150   :  { %v1646_v13 = vsel %vm134_vm0, %v1642_v12, 0.0  ;;  %2314 = vmatprep.subr.bf16.mxu1 %v2554_v15 }
0x1151   :  { %1647 = vadd.xlane.f32.xlu1 %v1646_v13 }
0x1153   :  { %2315 = vmatpush3.bf16.msra.mxu1 %v2408_v18 }
0x1154   :  { %2332 = vmatprep.subr.bf16.mxu1 %v2554_v15 }
0x11dc   :  { %v1645_v16 = vpop.xlane.xlu0 %1644 }
0x11dd   :  { %v1649_v17 = vmul.f32 0.03125, %v1645_v16 }
0x11de   :  { %v1648_v19 = vpop.xlane.xlu1 %1647 }
0x11df   :  { %v1651_v20 = vsub.f32 %v1641_v10, %v1649_v17  ;;  %v1650_v21 = vmul.f32 0.03125, %v1648_v19 }
0x11e1   :  { %v1652_v14 = vsub.f32 %v1642_v12, %v1650_v21  ;;  %v1653_v22 = vmul.f32 %v1651_v20, %v1651_v20 }
0x11e3   :  { %v1655_v23 = vsel %vm134_vm0, %v1653_v22, 0.0  ;;  %v1654_v6 = vmul.f32 %v1652_v14, %v1652_v14 }
0x11e4   :  { %1656 = vadd.xlane.f32.xlu0 %v1655_v23 }
0x11e5   :  { %v1658_v24 = vsel %vm134_vm0, %v1654_v6, 0.0 }
0x11e8   :  { %1659 = vadd.xlane.f32.xlu0 %v1658_v24  ;;  %v2413_v24 = vld [vmem:[%s2714_s27] sm:$0xff]   ;;  %s2562_s27 = smov [#allocation2]  }
0x11e9   :  { %s1976_s2 = sshll.u32 %s2562_s27, 4  ;;  %s1977_s2 = int_to_ptr.vmem [resolvable:$true] %s1976_s2 }
0x11ea   :  { %s2475_s7 = scalar_lea.vmem %s1977_s2, 256  ;;  %p2480_p1 = scmp.lt.s32.totalorder %s1977_s2, %s1977_s2 }
0x11eb   :  { %p2476_p0 = scmp.ne.s32.totalorder %s1977_s2, %s2475_s7  ;;  %p2481_p2 = scmp.lt.s32.totalorder %s2475_s7, %s2475_s7 }
0x11ed   :  { %p2482_p3 = por %p2481_p2, %p2480_p1 }
0x11ef   :  { %p2483_p4 = pnand %p2482_p3, %p2476_p0 }
0x1271   :  { %v1657_v25 = vpop.xlane.xlu0 %1656 }
0x1272   :  { %v1661_v26 = vmul.f32 0.03125, %v1657_v25 }
0x1274   :  { %v1663_v27 = vadd.f32 1e-12, %v1661_v26 }
0x1275   :  { %v1660_v28 = vpop.xlane.xlu0 %1659 }
0x1276   :  { %2463 = vrsqrt.f32 %v1663_v27  ;;  %v1662_v29 = vmul.f32 0.03125, %v1660_v28 }
0x1278   :  { %v1664_v30 = vadd.f32 1e-12, %v1662_v29 }
0x127a   :  { %2465 = vrsqrt.f32 %v1664_v30 }
0x1280   :  { %v2464_v33 = vpop.eup %2463 }
0x1281   :  { %v1667_v34 = vmul.f32 %v2464_v33, %v1651_v20  ;;  %v2095_v33 = vld [vmem:[%s3068_s28] ss:$0 sm:$0xff] }
0x1283   :  { %v1676_v37 = vmul.f32 %v2083_v35, %v1667_v34 }
0x1284   :  { %v2466_v36 = vpop.eup %2465 }
0x1285   :  { %v1668_v38 = vmul.f32 %v2466_v36, %v1652_v14  ;;  %v1685_v43 = vadd.f32 %v2084_v40, %v1676_v37  ;;  %v2096_v36 = vld [vmem:[%s3069_s1] ss:$0 sm:$0xff] }
0x1287   :  { %v1677_v41 = vmul.f32 %v2083_v35, %v1668_v38 }
0x1289   :  { %v1686_v44 = vadd.f32 %v2084_v40, %v1677_v41 }
0x128b   :  { %v1691_v45 = vpack.c.bf16 %v1686_v44, %v1685_v43 }
0x128d   :  { %2317 = vmatmul.mubr.msk.bf16.vlgmr.msra.gmra.mrb[40].mxu1 %vm134_vm0, %v1691_v45 }
0x128e   :  { %2336 = vmatprep.mubr.msk.bf16.mxu1 %vm2555_vm1, %v2554_v15  ;;  %2333 = vmatpush3.bf16.msra.mxu1 %v2413_v24 }
0x128f   :  { %2334 = vmatprep.subr.bf16.mxu1 %v2554_v15 }
0x1292   :  { %2335 = vmatpush3.bf16.msra.mxu1 %v2414_v7 }
0x1360   :  { %v1748_v50 = vpop.f32.mrb[40].mxu1 }
0x1361   :  { %v1749_v51 = vadd.f32 %v2085_v49, %v1748_v50  ;;  %v2318_v31 = vpop.f32.mrb[41].mxu1 }
0x1362   :  { %v1751_v52 = vpop.f32.mrb[42].mxu1 }
0x1363   :  { %v1757_v32 = vmul.f32 0.70710677, %v1749_v51  ;;  %v1752_v42 = vadd.f32 %v2085_v49, %v1751_v52  ;;  %v2319_v53 = vpop.f32.mrb[43].mxu1  ;;  %v1755_v58 = vmul.f32 0.5, %v1749_v51 }
0x1365   :  { %2467 = verf.f32 %v1757_v32  ;;  %v1758_v55 = vmul.f32 0.70710677, %v1752_v42  ;;  %v1756_v59 = vmul.f32 0.5, %v1752_v42 }
0x1367   :  { %2469 = verf.f32 %v1758_v55 }
0x136f   :  { %v2468_v54 = vpop.eup %2467 }
0x1370   :  { %v1761_v56 = vadd.f32 1.0, %v2468_v54 }
0x1371   :  { %v2470_v57 = vpop.eup %2469 }
0x1372   :  { %v1762_v60 = vadd.f32 1.0, %v2470_v57  ;;  %v1763_v61 = vmul.f32 %v1761_v56, %v1755_v58 }
0x1374   :  { %v1764_v62 = vmul.f32 %v1762_v60, %v1756_v59 }
0x1376   :  { %v1773_v63 = vpack.c.bf16 %v1764_v62, %v1763_v61 }
0x1378   :  { %2329 = vmatmul.mubr.msk.bf16.vlgmr.msra.gmra.mrb[48].mxu0 %vm956_vm5, %v1773_v63 }
0x144b   :  { %v1842_v1 = vpop.f32.mrb[48].mxu0 }
0x144c   :  { %v1843_v2 = vadd.f32 %v2089_v0, %v1842_v1  ;;  %v2330_v3 = vpop.f32.mrb[49].mxu0 }
0x144d   :  { %v1845_v5 = vpop.f32.mrb[50].mxu0 }
0x144e   :  { %v1846_v4 = vadd.f32 %v2089_v0, %v1845_v5  ;;  %v2331_v8 = vpop.f32.mrb[51].mxu0  ;;  %v1849_v9 = vadd.f32 %v1843_v2, %v1685_v43 }
0x1450   :  { %v1851_v10 = vsel %vm134_vm0, %v1849_v9, 0.0  ;;  %v1850_v11 = vadd.f32 %v1846_v4, %v1686_v44 }
0x1451   :  { %1852 = vadd.xlane.f32.xlu1 %v1851_v10 }
0x1452   :  { %v1854_v12 = vsel %vm134_vm0, %v1850_v11, 0.0 }
0x1453   :  { %1855 = vadd.xlane.f32.xlu0 %v1854_v12 }
0x14de   :  { %v1853_v13 = vpop.xlane.xlu1 %1852 }
0x14df   :  { %v1857_v16 = vmul.f32 0.03125, %v1853_v13 }
0x14e0   :  { %v1856_v17 = vpop.xlane.xlu0 %1855 }
0x14e1   :  { %v1859_v19 = vsub.f32 %v1849_v9, %v1857_v16  ;;  %v1858_v20 = vmul.f32 0.03125, %v1856_v17 }
0x14e3   :  { %v1860_v21 = vsub.f32 %v1850_v11, %v1858_v20  ;;  %v1861_v14 = vmul.f32 %v1859_v19, %v1859_v19 }
0x14e5   :  { %v1863_v22 = vsel %vm134_vm0, %v1861_v14, 0.0  ;;  %v1862_v23 = vmul.f32 %v1860_v21, %v1860_v21 }
0x14e6   :  { %1864 = vadd.xlane.f32.xlu1 %v1863_v22 }
0x14e7   :  { %v1866_v6 = vsel %vm134_vm0, %v1862_v23, 0.0 }
0x14e8   :  { %1867 = vadd.xlane.f32.xlu0 %v1866_v6 }
0x1573   :  { %v1865_v18 = vpop.xlane.xlu1 %1864 }
0x1574   :  { %v1869_v25 = vmul.f32 0.03125, %v1865_v18 }
0x1575   :  { %v1868_v26 = vpop.xlane.xlu0 %1867 }
0x1576   :  { %v1871_v27 = vadd.f32 1e-12, %v1869_v25  ;;  %v1870_v28 = vmul.f32 0.03125, %v1868_v26 }
0x1578   :  { %2471 = vrsqrt.f32 %v1871_v27  ;;  %v1872_v29 = vadd.f32 1e-12, %v1870_v28 }
0x157a   :  { %2473 = vrsqrt.f32 %v1872_v29 }
0x1582   :  { %v2472_v30 = vpop.eup %2471 }
0x1583   :  { %v1875_v34 = vmul.f32 %v2472_v30, %v1859_v19 }
0x1584   :  { %v2474_v35 = vpop.eup %2473 }
0x1585   :  { %v1884_v37 = vmul.f32 %v2095_v33, %v1875_v34  ;;  %v1876_v38 = vmul.f32 %v2474_v35, %v1860_v21 }
0x1587   :  { %v1893_v40 = vadd.f32 %v2096_v36, %v1884_v37  ;;  %v1885_v41 = vmul.f32 %v2095_v33, %v1876_v38 }
0x1589   :  { %1895 = vst.msk [vmem:[#allocation2] sm:$0xff] %vm134_vm0, %v1893_v40  ;;  %v1894_v15 = vadd.f32 %v2096_v36, %v1885_v41 }
0x158b   :  { %1896 = vst.msk [vmem:[#allocation2 + $0x8] sm:$0xff] %vm134_vm0, %v1894_v15  ;;  %v1898_v43 = vrot.slane %v1894_v15, 7 }
0x158d   :  { %v1901_v44 = vsel %vm1900_vm6, %v1893_v40, %v1898_v43 }
0x158e   :  { %v1906_v45 = vpack.c.bf16 %v1901_v44, %v1901_v44 }
0x1590   :  { %2337 = vmatmul.mubr.msk.bf16.vlgmr.msra.gmra.mrb[44].mxu1 %vm134_vm0, %v1906_v45 }
0x1591   :  { %2486 = shalt.err (!%p2483_p4)
}
0x1592   :  { %s2487_s10 = scalar_lea.hbm %s2724_s12, 256 }
0x1593   :  { %p2488_p5 = scmp.ne.s32.totalorder %s2724_s12, %s2487_s10  ;;  %p2491_p6 = scmp.lt.u32.totalorder %s2487_s10, %s2724_s12 }
0x1595   :  { %p2493_p7 = pnand %p2491_p6, %p2488_p5 }
0x1597   :  { %2496 = shalt.err (!%p2493_p7)
}
0x1598   :  { %s2563_s11 = smov 128   ;;  %s2564_s15 = smov 8   ;;  %v2097_v46 = vld [vmem:[%s2719_s4] ss:$0 sm:$0xff]  ;;  %vm1969_vm7 = vcmask 9216  }
0x1599   :  { %1982 = dma.vmem_to_hbm [thread:$0]  %s1977_s2, 256, %s2724_s12, [#allocation3], %s2563_s11, %s2563_s11, %s2564_s15  }
0x159a   :  { %s2565_s16 = smov [#allocation4]  }
0x159b   :  { %s1989_s18 = sshll.u32 %s2565_s16, 4  ;;  %s1990_s18 = int_to_ptr.vmem [resolvable:$true] %s1989_s18 }
0x159c   :  { %s2497_s0 = scalar_lea.vmem %s1990_s18, 32  ;;  %p2502_p9 = scmp.lt.s32.totalorder %s1990_s18, %s1990_s18 }
0x159d   :  { %p2498_p8 = scmp.ne.s32.totalorder %s1990_s18, %s2497_s0  ;;  %p2503_p10 = scmp.lt.s32.totalorder %s2497_s0, %s2497_s0 }
0x159f   :  { %p2504_p11 = por %p2503_p10, %p2502_p9 }
0x15a1   :  { %p2505_p12 = pnand %p2504_p11, %p2498_p8 }
0x1663   :  { %v1963_v47 = vpop.f32.mrb[44].mxu1 }
0x1664   :  { %v1964_v48 = vadd.f32 %v2097_v46, %v1963_v47  ;;  %v2338_v39 = vpop.f32.mrb[45].mxu1 }
0x1665   :  { %v1966_v49 = vpop.f32.mrb[46].mxu1 }
0x1666   :  { %v2339_v50 = vpop.f32.mrb[47].mxu1  ;;  %1970 = vst.msk [vmem:[#allocation4] sm:$0x3] %vm1969_vm7, %v1964_v48 }
0x1667   :  { %2508 = shalt.err (!%p2505_p12)
}
0x1668   :  { %s2509_s12 = scalar_lea.hbm %s2729_s20, 32 }
0x1669   :  { %p2510_p13 = scmp.ne.s32.totalorder %s2729_s20, %s2509_s12  ;;  %p2513_p0 = scmp.lt.u32.totalorder %s2509_s12, %s2729_s20 }
0x166b   :  { %p2515_p1 = pnand %p2513_p0, %p2510_p13 }
0x166d   :  { %2518 = shalt.err (!%p2515_p1)
}
0x166e   :  { %1992 = dma.vmem_to_hbm [thread:$0]  %s1990_s18, 32, %s2729_s20, [#allocation5]  }
0x166f   :  { %2519 = dma.done.wait [#allocation3], 256  }
0x1670   :  { %2520 = vsyncadd [#allocation3], 4294967040 }
0x1671   :  { %2521 = dma.done.wait [#allocation5], 32  }
0x1672   :  { %2522 = vsyncadd [#allocation5], 4294967264 }
0x1673   :  { %1999 = vsyncpa [#allocation3], 1 }
0x1674   :  { %2000 = vsyncpa [#allocation5], 1 }

</bundles_post_ra>
